<compile_context>
chip_gen: v6e
topology: v6e:2x2x1
jax: 0.10.0
libtpu: 0.0.40
codegen_flags: <defaults>
</compile_context>

<pallas_src>
import numpy as np
import jax
import jax.numpy as jnp
from jax import lax
from jax.experimental import pallas as pl
from jax.experimental.pallas import tpu as pltpu

# ----------------------------- hyper-params (small test sizes) -----------------
B = 2                     # batch
C = 16                    # channel dim of x
MAX_LEN_SEQ = 16          # hparams.max_len_seq
MAX_LEN_PAD = 32          # hparams.max_len_pad (x is padded to this length)
MIN_LEN_SEG = 4           # hparams.min_len_seg
MAX_LEN_SEG = 8           # hparams.max_len_seg
MAX_NUM_SEG = MAX_LEN_SEQ // MIN_LEN_SEG + 1     # = 5

R = B * MAX_NUM_SEG       # candidate rows (batch x segment)           = 10
L2 = 2 * MAX_LEN_SEG      # candidate columns (within-segment index j) = 16
T_IN = MAX_LEN_PAD        # source frames per batch element            = 32
T_OUT = MAX_LEN_PAD       # output frames per batch element            = 32
GT = B * T_OUT            # global output rows                         = 64
GI = B * T_IN             # global input rows                          = 64

_BATCH_OF_ROW = np.repeat(np.arange(B, dtype=np.float32), MAX_NUM_SEG)   # (R,)


def _fiota(shape, dim):
    return lax.broadcasted_iota(jnp.int32, shape, dim).astype(jnp.float32)


# ------------------------------ Pallas kernel ----------------------------------
def interp_kernel(x_ref, params_ref, o_ref):
    """Whole-batch InterpLnr forward in one invocation.

    x_ref      : (B*T_IN, C)   source frames, batch stacked along rows
    params_ref : (R, L2+3)     per candidate-row data:
                   [:, :L2]   idx_scaled = j / scale
                   [:, L2+0]  len_seg   (random segment length, f32)
                   [:, L2+1]  len_seq   (valid length of this row's batch, f32)
                   [:, L2+2]  batch id  (0..B-1, f32)
    o_ref      : (B*T_OUT, C)  warped + zero-padded output
    """
    f32 = jnp.float32

    idx_scaled = params_ref[:, 0:L2]               # (R, L2)
    len_seg = params_ref[:, L2:L2 + 1]             # (R, 1)
    len_seq = params_ref[:, L2 + 1:L2 + 2]         # (R, 1)
    batchof = params_ref[:, L2 + 2:L2 + 3]         # (R, 1)

    fl = jnp.floor(idx_scaled)                     # (R, L2) floor source index
    lam = idx_scaled - fl                          # (R, L2) interpolation weight

    # Strict-lower-triangular-within-batch selector (R, R): bmat[r, c] = 1 iff
    # row c precedes row r inside the same batch element (static B, unrolled).
    ri = lax.broadcasted_iota(jnp.int32, (R, R), 0)
    ci = lax.broadcasted_iota(jnp.int32, (R, R), 1)
    bmat = jnp.zeros((R, R), f32)
    for b in range(B):
        lo, hi = b * MAX_NUM_SEG, (b + 1) * MAX_NUM_SEG
        blk = (ri >= lo) & (ri < hi) & (ci >= lo) & (ci < hi) & (ci < ri)
        bmat = bmat + blk.astype(f32)

    # Exclusive per-batch cumulative segment offset, broadcast along L2
    # (values are small exact integers -> f32 matmul is exact).
    len_seg_b = jnp.zeros((R, L2), f32) + len_seg                       # (R, L2)
    offset = jnp.dot(bmat, len_seg_b, preferred_element_type=f32)       # (R, L2)

    src = fl + offset                                                    # source frame index
    # Mask guarantees src + 1 <= len_seq - 1 < T_IN, so the "ceil" tap never
    # leaves the owning batch's block of x.
    mask = (fl < (len_seg - 1.0)) & (src < (len_seq - 1.0))              # (R, L2)
    mask_f = mask.astype(f32)

    # Compacted output position of every valid candidate within its batch:
    #   pos = (# valid in earlier rows of the batch) + (# valid earlier in row)
    ja = lax.broadcasted_iota(jnp.int32, (L2, L2), 0)
    jb = lax.broadcasted_iota(jnp.int32, (L2, L2), 1)
    lstrict = (ja < jb).astype(f32)                                      # (L2, L2)
    within = jnp.dot(mask_f, lstrict, preferred_element_type=f32)        # (R, L2)
    prev = jnp.sum(jnp.dot(bmat, mask_f, preferred_element_type=f32),
                   axis=1, keepdims=True)                                # (R, 1)
    pos = prev + within                                                  # (R, L2)

    # Candidate -> global output row / global source center / keep flag.
    # (pos < T_OUT) reproduces pad_sequences' truncation to max_len_pad.
    g = pos + batchof * float(T_OUT)                                     # (R, L2)
    center = src + lam + batchof * float(T_IN)                           # (R, L2)
    take = jnp.where(mask & (pos < float(T_OUT)), 1.0, 0.0)              # (R, L2)

    # Scatter the (exactly one per populated output row) candidate center onto
    # the B*T_OUT output rows.  R = 10, static unroll of cheap VPU/XLU ops.
    go = _fiota((GT, L2), 0)
    valid_g = jnp.zeros((GT, 1), f32)
    cent_g = jnp.zeros((GT, 1), f32)
    for r in range(R):
        sel = (go == g[r:r + 1, :]).astype(f32) * take[r:r + 1, :]       # (GT, L2)
        valid_g = valid_g + jnp.sum(sel, axis=1, keepdims=True)
        cent_g = cent_g + jnp.sum(sel * center[r:r + 1, :],
                                  axis=1, keepdims=True)

    # Block-diagonal dense interpolation ("tent") matrix + ONE MXU matmul for
    # the whole batch + ONE dense store.  Rows with valid_g == 0 are zero
    # (= the zero padding of pad_sequences).
    gi = _fiota((GT, GI), 1)
    w = valid_g * jnp.maximum(0.0, 1.0 - jnp.abs(gi - cent_g))           # (GT, GI)
    o_ref[...] = jnp.dot(w, x_ref[...], preferred_element_type=f32)


# ------------------------- glue: random draws & packing -------------------------
def _draw_random(key):
    """scales ~ U[0.5,1.5), len_seg ~ randint[min_len_seg, max_len_seg)."""
    k1, k2 = jax.random.split(key)
    scales = jax.random.uniform(k1, (R,), jnp.float32) + 0.5
    len_seg = jax.random.randint(k2, (R, 1), MIN_LEN_SEG, MAX_LEN_SEG,
                                 dtype=jnp.int32)
    return scales, len_seg


def _pack_params(scales, len_seg, len_seq):
    """One small (R, L2+3) lane-major side input for the kernel."""
    idx = jnp.arange(L2, dtype=jnp.float32)[None, :]
    idx_scaled = idx / scales[:, None]                                    # (R, L2)
    cols = jnp.stack(
        [len_seg.reshape(-1).astype(jnp.float32),
         jnp.repeat(len_seq.astype(jnp.float32), MAX_NUM_SEG),
         jnp.asarray(_BATCH_OF_ROW)], axis=1)                             # (R, 3)
    return jnp.concatenate([idx_scaled, cols], axis=1)                    # (R, L2+3)


# ------------------------------- forward wrapper --------------------------------
def interp_lnr_forward(x, len_seq, key, training=True):
    """x: (B, MAX_LEN_PAD, C) f32, len_seq: (B,) int32."""
    if not training:
        return x  # eval mode: module is the identity

    # TODO(synk): torch's global RNG stream cannot be reproduced on TPU; the
    # random scales / segment lengths are drawn with jax.random from `key`.
    scales, len_seg = _draw_random(key)
    params = _pack_params(scales, len_seg, len_seq)
    x2 = x.reshape(GI, C)                          # contiguous -> free reshape

    out2 = pl.pallas_call(
        interp_kernel,
        out_shape=jax.ShapeDtypeStruct((GT, C), jnp.float32),
        in_specs=[pl.BlockSpec(memory_space=pltpu.MemorySpace.VMEM),
                  pl.BlockSpec(memory_space=pltpu.MemorySpace.VMEM)],
        out_specs=pl.BlockSpec(memory_space=pltpu.MemorySpace.VMEM),
    )(x2, params)

    return out2.reshape(B, MAX_LEN_PAD, C)         # contiguous -> free reshape


# --------------------------- pure-JAX reference ----------------------------------
def interp_lnr_reference(x, len_seq, key):
    """Straightforward gather + scatter transcription of the PyTorch forward."""
    scales, len_seg = _draw_random(key)
    idx = jnp.arange(L2, dtype=jnp.float32)[None, :]
    idx_scaled = idx / scales[:, None]
    idx_fl = jnp.floor(idx_scaled)
    lam = idx_scaled - idx_fl
    idx_mask = idx_fl < (len_seg.astype(jnp.float32) - 1.0)
    offset = jnp.cumsum(len_seg.reshape(B, MAX_NUM_SEG), axis=-1)
    offset = jnp.pad(offset[:, :-1], ((0, 0), (1, 0))).reshape(-1, 1)
    idx_org = idx_fl + offset.astype(jnp.float32)
    len_seq_rp = jnp.repeat(len_seq, MAX_NUM_SEG)
    idx_mask_org = idx_org < (len_seq_rp[:, None] - 1).astype(jnp.float32)
    mask = idx_mask & idx_mask_org

    fl = idx_org.astype(jnp.int32)
    cl = fl + 1
    b_ids = jnp.broadcast_to(
        jnp.repeat(jnp.arange(B), MAX_NUM_SEG)[:, None], fl.shape)
    y_fl = x[b_ids, fl]
    y_cl = x[b_ids, cl]
    y = (1.0 - lam)[..., None] * y_fl + lam[..., None] * y_cl

    mask_b = mask.reshape(B, -1)
    y_b = y.reshape(B, -1, C)
    m_i = mask_b.astype(jnp.int32)
    pos = jnp.cumsum(m_i, axis=-1) - m_i
    dst = jnp.where(mask_b, pos, MAX_LEN_PAD)
    bb = jnp.broadcast_to(jnp.arange(B)[:, None], dst.shape)
    out = jnp.zeros((B, MAX_LEN_PAD + 1, C), jnp.float32)
    out = out.at[bb, dst].set(jnp.where(mask_b[..., None], y_b, 0.0), mode="drop")
    return out[:, :MAX_LEN_PAD]


# ------------------------------------ main ---------------------------------------
if __name__ == "__main__":
    key = jax.random.PRNGKey(0)
    kx, kr = jax.random.split(key)

    x = jax.random.normal(kx, (B, MAX_LEN_PAD, C), jnp.float32)
    len_seq = jnp.array([MAX_LEN_SEQ, MAX_LEN_SEQ - 4], jnp.int32)

    out = jax.jit(interp_lnr_forward)(x, len_seq, kr)
    out = jax.block_until_ready(out)

    ref = interp_lnr_reference(x, len_seq, kr)
    assert out.shape == (B, MAX_LEN_PAD, C), out.shape
    assert jnp.allclose(out, ref, atol=1e-4, rtol=1e-4), \
        float(jnp.max(jnp.abs(out - ref)))

    print("KERNEL_OK")
</pallas_src>

<mosaic_0001>
module attributes {stable_mosaic.version = 11 : i64} {
  func.func @interp_kernel(%arg0: memref<64x16xf32, #tpu.memory_space<vmem>>, %arg1: memref<10x19xf32, #tpu.memory_space<vmem>>, %arg2: memref<64x16xf32, #tpu.memory_space<vmem>>) attributes {dimension_semantics = [], scalar_prefetch = 0 : i64, scratch_operands = 0 : i64, tpu.core_type = #tpu.core_type<tc>} {
    %c0 = arith.constant 0 : index
    %c0_0 = arith.constant 0 : index
    %0 = vector.load %arg1[%c0, %c0_0] : memref<10x19xf32, #tpu.memory_space<vmem>>, vector<10x16xf32>
    %c0_1 = arith.constant 0 : index
    %c16 = arith.constant 16 : index
    %1 = vector.load %arg1[%c0_1, %c16] : memref<10x19xf32, #tpu.memory_space<vmem>>, vector<10x1xf32>
    %c0_2 = arith.constant 0 : index
    %c17 = arith.constant 17 : index
    %2 = vector.load %arg1[%c0_2, %c17] : memref<10x19xf32, #tpu.memory_space<vmem>>, vector<10x1xf32>
    %c0_3 = arith.constant 0 : index
    %c18 = arith.constant 18 : index
    %3 = vector.load %arg1[%c0_3, %c18] : memref<10x19xf32, #tpu.memory_space<vmem>>, vector<10x1xf32>
    %4 = math.floor %0 : vector<10x16xf32>
    %5 = arith.subf %0, %4 : vector<10x16xf32>
    %6 = tpu.iota {dimensions = array<i32: 0>} : vector<10x10xi32>
    %7 = tpu.iota {dimensions = array<i32: 1>} : vector<10x10xi32>
    %cst = arith.constant 0.000000e+00 : f32
    %8 = vector.broadcast %cst : f32 to vector<10x10xf32>
    %c0_i32 = arith.constant 0 : i32
    %9 = vector.broadcast %c0_i32 : i32 to vector<10x10xi32>
    %10 = arith.cmpi sge, %6, %9 : vector<10x10xi32>
    %c5_i32 = arith.constant 5 : i32
    %11 = vector.broadcast %c5_i32 : i32 to vector<10x10xi32>
    %12 = arith.cmpi slt, %6, %11 : vector<10x10xi32>
    %13 = arith.andi %10, %12 : vector<10x10xi1>
    %c0_i32_4 = arith.constant 0 : i32
    %14 = vector.broadcast %c0_i32_4 : i32 to vector<10x10xi32>
    %15 = arith.cmpi sge, %7, %14 : vector<10x10xi32>
    %16 = arith.andi %13, %15 : vector<10x10xi1>
    %c5_i32_5 = arith.constant 5 : i32
    %17 = vector.broadcast %c5_i32_5 : i32 to vector<10x10xi32>
    %18 = arith.cmpi slt, %7, %17 : vector<10x10xi32>
    %19 = arith.andi %16, %18 : vector<10x10xi1>
    %20 = arith.cmpi slt, %7, %6 : vector<10x10xi32>
    %21 = arith.andi %19, %20 : vector<10x10xi1>
    %22 = arith.extui %21 : vector<10x10xi1> to vector<10x10xi32>
    %23 = arith.sitofp %22 : vector<10x10xi32> to vector<10x10xf32>
    %24 = arith.addf %8, %23 : vector<10x10xf32>
    %c5_i32_6 = arith.constant 5 : i32
    %25 = vector.broadcast %c5_i32_6 : i32 to vector<10x10xi32>
    %26 = arith.cmpi sge, %6, %25 : vector<10x10xi32>
    %c10_i32 = arith.constant 10 : i32
    %27 = vector.broadcast %c10_i32 : i32 to vector<10x10xi32>
    %28 = arith.cmpi slt, %6, %27 : vector<10x10xi32>
    %29 = arith.andi %26, %28 : vector<10x10xi1>
    %c5_i32_7 = arith.constant 5 : i32
    %30 = vector.broadcast %c5_i32_7 : i32 to vector<10x10xi32>
    %31 = arith.cmpi sge, %7, %30 : vector<10x10xi32>
    %32 = arith.andi %29, %31 : vector<10x10xi1>
    %c10_i32_8 = arith.constant 10 : i32
    %33 = vector.broadcast %c10_i32_8 : i32 to vector<10x10xi32>
    %34 = arith.cmpi slt, %7, %33 : vector<10x10xi32>
    %35 = arith.andi %32, %34 : vector<10x10xi1>
    %36 = arith.cmpi slt, %7, %6 : vector<10x10xi32>
    %37 = arith.andi %35, %36 : vector<10x10xi1>
    %38 = arith.extui %37 : vector<10x10xi1> to vector<10x10xi32>
    %39 = arith.sitofp %38 : vector<10x10xi32> to vector<10x10xf32>
    %40 = arith.addf %24, %39 : vector<10x10xf32>
    %cst_9 = arith.constant 0.000000e+00 : f32
    %41 = vector.broadcast %cst_9 : f32 to vector<10x16xf32>
    %42 = vector.broadcast %1 : vector<10x1xf32> to vector<10x16xf32>
    %43 = arith.addf %41, %42 : vector<10x16xf32>
    %cst_10 = arith.constant dense<0.000000e+00> : vector<10x16xf32>
    %44 = tpu.matmul %40, %43, %cst_10 {dimension_numbers = #tpu.dot_dimension_numbers<[1], [0], [0], [1], [0, 0, 1, 1], [], []>} : vector<10x10xf32>, vector<10x16xf32>, vector<10x16xf32> -> vector<10x16xf32>
    %45 = arith.addf %4, %44 : vector<10x16xf32>
    %cst_11 = arith.constant 1.000000e+00 : f32
    %46 = vector.broadcast %cst_11 : f32 to vector<10x1xf32>
    %47 = arith.subf %1, %46 : vector<10x1xf32>
    %48 = vector.broadcast %47 : vector<10x1xf32> to vector<10x16xf32>
    %49 = arith.cmpf olt, %4, %48 : vector<10x16xf32>
    %cst_12 = arith.constant 1.000000e+00 : f32
    %50 = vector.broadcast %cst_12 : f32 to vector<10x1xf32>
    %51 = arith.subf %2, %50 : vector<10x1xf32>
    %52 = vector.broadcast %51 : vector<10x1xf32> to vector<10x16xf32>
    %53 = arith.cmpf olt, %45, %52 : vector<10x16xf32>
    %54 = arith.andi %49, %53 : vector<10x16xi1>
    %55 = arith.extui %54 : vector<10x16xi1> to vector<10x16xi32>
    %56 = arith.sitofp %55 : vector<10x16xi32> to vector<10x16xf32>
    %57 = tpu.iota {dimensions = array<i32: 0>} : vector<16x16xi32>
    %58 = tpu.iota {dimensions = array<i32: 1>} : vector<16x16xi32>
    %59 = arith.cmpi slt, %57, %58 : vector<16x16xi32>
    %60 = arith.extui %59 : vector<16x16xi1> to vector<16x16xi32>
    %61 = arith.sitofp %60 : vector<16x16xi32> to vector<16x16xf32>
    %cst_13 = arith.constant dense<0.000000e+00> : vector<10x16xf32>
    %62 = tpu.matmul %56, %61, %cst_13 {dimension_numbers = #tpu.dot_dimension_numbers<[1], [0], [0], [1], [0, 0, 1, 1], [], []>} : vector<10x16xf32>, vector<16x16xf32>, vector<10x16xf32> -> vector<10x16xf32>
    %cst_14 = arith.constant dense<0.000000e+00> : vector<10x16xf32>
    %63 = tpu.matmul %40, %56, %cst_14 {dimension_numbers = #tpu.dot_dimension_numbers<[1], [0], [0], [1], [0, 0, 1, 1], [], []>} : vector<10x10xf32>, vector<10x16xf32>, vector<10x16xf32> -> vector<10x16xf32>
    %cst_15 = arith.constant dense<0.000000e+00> : vector<10xf32>
    %64 = vector.multi_reduction <add>, %63, %cst_15 [1] : vector<10x16xf32> to vector<10xf32>
    %65 = vector.shape_cast %64 : vector<10xf32> to vector<10x1xf32>
    %66 = vector.broadcast %65 : vector<10x1xf32> to vector<10x16xf32>
    %67 = arith.addf %66, %62 : vector<10x16xf32>
    %cst_16 = arith.constant 3.200000e+01 : f32
    %68 = vector.broadcast %cst_16 : f32 to vector<10x1xf32>
    %69 = arith.mulf %3, %68 : vector<10x1xf32>
    %70 = vector.broadcast %69 : vector<10x1xf32> to vector<10x16xf32>
    %71 = arith.addf %67, %70 : vector<10x16xf32>
    %72 = arith.addf %45, %5 : vector<10x16xf32>
    %cst_17 = arith.constant 3.200000e+01 : f32
    %73 = vector.broadcast %cst_17 : f32 to vector<10x1xf32>
    %74 = arith.mulf %3, %73 : vector<10x1xf32>
    %75 = vector.broadcast %74 : vector<10x1xf32> to vector<10x16xf32>
    %76 = arith.addf %72, %75 : vector<10x16xf32>
    %cst_18 = arith.constant 3.200000e+01 : f32
    %77 = vector.broadcast %cst_18 : f32 to vector<10x16xf32>
    %78 = arith.cmpf olt, %67, %77 : vector<10x16xf32>
    %79 = arith.andi %54, %78 : vector<10x16xi1>
    %cst_19 = arith.constant 1.000000e+00 : f32
    %cst_20 = arith.constant 0.000000e+00 : f32
    %80 = vector.broadcast %cst_19 : f32 to vector<10x16xf32>
    %81 = vector.broadcast %cst_20 : f32 to vector<10x16xf32>
    %82 = arith.select %79, %80, %81 : vector<10x16xi1>, vector<10x16xf32>
    %83 = tpu.iota {dimensions = array<i32: 0>} : vector<64x16xi32>
    %84 = arith.sitofp %83 : vector<64x16xi32> to vector<64x16xf32>
    %cst_21 = arith.constant 0.000000e+00 : f32
    %85 = vector.broadcast %cst_21 : f32 to vector<64x1xf32>
    %cst_22 = arith.constant 0.000000e+00 : f32
    %86 = vector.broadcast %cst_22 : f32 to vector<64x1xf32>
    %87 = vector.extract_strided_slice %71 {offsets = [0, 0], sizes = [1, 16], strides = [1, 1]} : vector<10x16xf32> to vector<1x16xf32>
    %88 = vector.broadcast %87 : vector<1x16xf32> to vector<64x16xf32>
    %89 = arith.cmpf oeq, %84, %88 : vector<64x16xf32>
    %90 = arith.extui %89 : vector<64x16xi1> to vector<64x16xi32>
    %91 = arith.sitofp %90 : vector<64x16xi32> to vector<64x16xf32>
    %92 = vector.extract_strided_slice %82 {offsets = [0, 0], sizes = [1, 16], strides = [1, 1]} : vector<10x16xf32> to vector<1x16xf32>
    %93 = vector.broadcast %92 : vector<1x16xf32> to vector<64x16xf32>
    %94 = arith.mulf %91, %93 : vector<64x16xf32>
    %cst_23 = arith.constant dense<0.000000e+00> : vector<64xf32>
    %95 = vector.multi_reduction <add>, %94, %cst_23 [1] : vector<64x16xf32> to vector<64xf32>
    %96 = vector.shape_cast %95 : vector<64xf32> to vector<64x1xf32>
    %97 = arith.addf %85, %96 : vector<64x1xf32>
    %98 = vector.extract_strided_slice %76 {offsets = [0, 0], sizes = [1, 16], strides = [1, 1]} : vector<10x16xf32> to vector<1x16xf32>
    %99 = vector.broadcast %98 : vector<1x16xf32> to vector<64x16xf32>
    %100 = arith.mulf %94, %99 : vector<64x16xf32>
    %cst_24 = arith.constant dense<0.000000e+00> : vector<64xf32>
    %101 = vector.multi_reduction <add>, %100, %cst_24 [1] : vector<64x16xf32> to vector<64xf32>
    %102 = vector.shape_cast %101 : vector<64xf32> to vector<64x1xf32>
    %103 = arith.addf %86, %102 : vector<64x1xf32>
    %104 = vector.extract_strided_slice %71 {offsets = [1, 0], sizes = [1, 16], strides = [1, 1]} : vector<10x16xf32> to vector<1x16xf32>
    %105 = vector.broadcast %104 : vector<1x16xf32> to vector<64x16xf32>
    %106 = arith.cmpf oeq, %84, %105 : vector<64x16xf32>
    %107 = arith.extui %106 : vector<64x16xi1> to vector<64x16xi32>
    %108 = arith.sitofp %107 : vector<64x16xi32> to vector<64x16xf32>
    %109 = vector.extract_strided_slice %82 {offsets = [1, 0], sizes = [1, 16], strides = [1, 1]} : vector<10x16xf32> to vector<1x16xf32>
    %110 = vector.broadcast %109 : vector<1x16xf32> to vector<64x16xf32>
    %111 = arith.mulf %108, %110 : vector<64x16xf32>
    %cst_25 = arith.constant dense<0.000000e+00> : vector<64xf32>
    %112 = vector.multi_reduction <add>, %111, %cst_25 [1] : vector<64x16xf32> to vector<64xf32>
    %113 = vector.shape_cast %112 : vector<64xf32> to vector<64x1xf32>
    %114 = arith.addf %97, %113 : vector<64x1xf32>
    %115 = vector.extract_strided_slice %76 {offsets = [1, 0], sizes = [1, 16], strides = [1, 1]} : vector<10x16xf32> to vector<1x16xf32>
    %116 = vector.broadcast %115 : vector<1x16xf32> to vector<64x16xf32>
    %117 = arith.mulf %111, %116 : vector<64x16xf32>
    %cst_26 = arith.constant dense<0.000000e+00> : vector<64xf32>
    %118 = vector.multi_reduction <add>, %117, %cst_26 [1] : vector<64x16xf32> to vector<64xf32>
    %119 = vector.shape_cast %118 : vector<64xf32> to vector<64x1xf32>
    %120 = arith.addf %103, %119 : vector<64x1xf32>
    %121 = vector.extract_strided_slice %71 {offsets = [2, 0], sizes = [1, 16], strides = [1, 1]} : vector<10x16xf32> to vector<1x16xf32>
    %122 = vector.broadcast %121 : vector<1x16xf32> to vector<64x16xf32>
    %123 = arith.cmpf oeq, %84, %122 : vector<64x16xf32>
    %124 = arith.extui %123 : vector<64x16xi1> to vector<64x16xi32>
    %125 = arith.sitofp %124 : vector<64x16xi32> to vector<64x16xf32>
    %126 = vector.extract_strided_slice %82 {offsets = [2, 0], sizes = [1, 16], strides = [1, 1]} : vector<10x16xf32> to vector<1x16xf32>
    %127 = vector.broadcast %126 : vector<1x16xf32> to vector<64x16xf32>
    %128 = arith.mulf %125, %127 : vector<64x16xf32>
    %cst_27 = arith.constant dense<0.000000e+00> : vector<64xf32>
    %129 = vector.multi_reduction <add>, %128, %cst_27 [1] : vector<64x16xf32> to vector<64xf32>
    %130 = vector.shape_cast %129 : vector<64xf32> to vector<64x1xf32>
    %131 = arith.addf %114, %130 : vector<64x1xf32>
    %132 = vector.extract_strided_slice %76 {offsets = [2, 0], sizes = [1, 16], strides = [1, 1]} : vector<10x16xf32> to vector<1x16xf32>
    %133 = vector.broadcast %132 : vector<1x16xf32> to vector<64x16xf32>
    %134 = arith.mulf %128, %133 : vector<64x16xf32>
    %cst_28 = arith.constant dense<0.000000e+00> : vector<64xf32>
    %135 = vector.multi_reduction <add>, %134, %cst_28 [1] : vector<64x16xf32> to vector<64xf32>
    %136 = vector.shape_cast %135 : vector<64xf32> to vector<64x1xf32>
    %137 = arith.addf %120, %136 : vector<64x1xf32>
    %138 = vector.extract_strided_slice %71 {offsets = [3, 0], sizes = [1, 16], strides = [1, 1]} : vector<10x16xf32> to vector<1x16xf32>
    %139 = vector.broadcast %138 : vector<1x16xf32> to vector<64x16xf32>
    %140 = arith.cmpf oeq, %84, %139 : vector<64x16xf32>
    %141 = arith.extui %140 : vector<64x16xi1> to vector<64x16xi32>
    %142 = arith.sitofp %141 : vector<64x16xi32> to vector<64x16xf32>
    %143 = vector.extract_strided_slice %82 {offsets = [3, 0], sizes = [1, 16], strides = [1, 1]} : vector<10x16xf32> to vector<1x16xf32>
    %144 = vector.broadcast %143 : vector<1x16xf32> to vector<64x16xf32>
    %145 = arith.mulf %142, %144 : vector<64x16xf32>
    %cst_29 = arith.constant dense<0.000000e+00> : vector<64xf32>
    %146 = vector.multi_reduction <add>, %145, %cst_29 [1] : vector<64x16xf32> to vector<64xf32>
    %147 = vector.shape_cast %146 : vector<64xf32> to vector<64x1xf32>
    %148 = arith.addf %131, %147 : vector<64x1xf32>
    %149 = vector.extract_strided_slice %76 {offsets = [3, 0], sizes = [1, 16], strides = [1, 1]} : vector<10x16xf32> to vector<1x16xf32>
    %150 = vector.broadcast %149 : vector<1x16xf32> to vector<64x16xf32>
    %151 = arith.mulf %145, %150 : vector<64x16xf32>
    %cst_30 = arith.constant dense<0.000000e+00> : vector<64xf32>
    %152 = vector.multi_reduction <add>, %151, %cst_30 [1] : vector<64x16xf32> to vector<64xf32>
    %153 = vector.shape_cast %152 : vector<64xf32> to vector<64x1xf32>
    %154 = arith.addf %137, %153 : vector<64x1xf32>
    %155 = vector.extract_strided_slice %71 {offsets = [4, 0], sizes = [1, 16], strides = [1, 1]} : vector<10x16xf32> to vector<1x16xf32>
    %156 = vector.broadcast %155 : vector<1x16xf32> to vector<64x16xf32>
    %157 = arith.cmpf oeq, %84, %156 : vector<64x16xf32>
    %158 = arith.extui %157 : vector<64x16xi1> to vector<64x16xi32>
    %159 = arith.sitofp %158 : vector<64x16xi32> to vector<64x16xf32>
    %160 = vector.extract_strided_slice %82 {offsets = [4, 0], sizes = [1, 16], strides = [1, 1]} : vector<10x16xf32> to vector<1x16xf32>
    %161 = vector.broadcast %160 : vector<1x16xf32> to vector<64x16xf32>
    %162 = arith.mulf %159, %161 : vector<64x16xf32>
    %cst_31 = arith.constant dense<0.000000e+00> : vector<64xf32>
    %163 = vector.multi_reduction <add>, %162, %cst_31 [1] : vector<64x16xf32> to vector<64xf32>
    %164 = vector.shape_cast %163 : vector<64xf32> to vector<64x1xf32>
    %165 = arith.addf %148, %164 : vector<64x1xf32>
    %166 = vector.extract_strided_slice %76 {offsets = [4, 0], sizes = [1, 16], strides = [1, 1]} : vector<10x16xf32> to vector<1x16xf32>
    %167 = vector.broadcast %166 : vector<1x16xf32> to vector<64x16xf32>
    %168 = arith.mulf %162, %167 : vector<64x16xf32>
    %cst_32 = arith.constant dense<0.000000e+00> : vector<64xf32>
    %169 = vector.multi_reduction <add>, %168, %cst_32 [1] : vector<64x16xf32> to vector<64xf32>
    %170 = vector.shape_cast %169 : vector<64xf32> to vector<64x1xf32>
    %171 = arith.addf %154, %170 : vector<64x1xf32>
    %172 = vector.extract_strided_slice %71 {offsets = [5, 0], sizes = [1, 16], strides = [1, 1]} : vector<10x16xf32> to vector<1x16xf32>
    %173 = vector.broadcast %172 : vector<1x16xf32> to vector<64x16xf32>
    %174 = arith.cmpf oeq, %84, %173 : vector<64x16xf32>
    %175 = arith.extui %174 : vector<64x16xi1> to vector<64x16xi32>
    %176 = arith.sitofp %175 : vector<64x16xi32> to vector<64x16xf32>
    %177 = vector.extract_strided_slice %82 {offsets = [5, 0], sizes = [1, 16], strides = [1, 1]} : vector<10x16xf32> to vector<1x16xf32>
    %178 = vector.broadcast %177 : vector<1x16xf32> to vector<64x16xf32>
    %179 = arith.mulf %176, %178 : vector<64x16xf32>
    %cst_33 = arith.constant dense<0.000000e+00> : vector<64xf32>
    %180 = vector.multi_reduction <add>, %179, %cst_33 [1] : vector<64x16xf32> to vector<64xf32>
    %181 = vector.shape_cast %180 : vector<64xf32> to vector<64x1xf32>
    %182 = arith.addf %165, %181 : vector<64x1xf32>
    %183 = vector.extract_strided_slice %76 {offsets = [5, 0], sizes = [1, 16], strides = [1, 1]} : vector<10x16xf32> to vector<1x16xf32>
    %184 = vector.broadcast %183 : vector<1x16xf32> to vector<64x16xf32>
    %185 = arith.mulf %179, %184 : vector<64x16xf32>
    %cst_34 = arith.constant dense<0.000000e+00> : vector<64xf32>
    %186 = vector.multi_reduction <add>, %185, %cst_34 [1] : vector<64x16xf32> to vector<64xf32>
    %187 = vector.shape_cast %186 : vector<64xf32> to vector<64x1xf32>
    %188 = arith.addf %171, %187 : vector<64x1xf32>
    %189 = vector.extract_strided_slice %71 {offsets = [6, 0], sizes = [1, 16], strides = [1, 1]} : vector<10x16xf32> to vector<1x16xf32>
    %190 = vector.broadcast %189 : vector<1x16xf32> to vector<64x16xf32>
    %191 = arith.cmpf oeq, %84, %190 : vector<64x16xf32>
    %192 = arith.extui %191 : vector<64x16xi1> to vector<64x16xi32>
    %193 = arith.sitofp %192 : vector<64x16xi32> to vector<64x16xf32>
    %194 = vector.extract_strided_slice %82 {offsets = [6, 0], sizes = [1, 16], strides = [1, 1]} : vector<10x16xf32> to vector<1x16xf32>
    %195 = vector.broadcast %194 : vector<1x16xf32> to vector<64x16xf32>
    %196 = arith.mulf %193, %195 : vector<64x16xf32>
    %cst_35 = arith.constant dense<0.000000e+00> : vector<64xf32>
    %197 = vector.multi_reduction <add>, %196, %cst_35 [1] : vector<64x16xf32> to vector<64xf32>
    %198 = vector.shape_cast %197 : vector<64xf32> to vector<64x1xf32>
    %199 = arith.addf %182, %198 : vector<64x1xf32>
    %200 = vector.extract_strided_slice %76 {offsets = [6, 0], sizes = [1, 16], strides = [1, 1]} : vector<10x16xf32> to vector<1x16xf32>
    %201 = vector.broadcast %200 : vector<1x16xf32> to vector<64x16xf32>
    %202 = arith.mulf %196, %201 : vector<64x16xf32>
    %cst_36 = arith.constant dense<0.000000e+00> : vector<64xf32>
    %203 = vector.multi_reduction <add>, %202, %cst_36 [1] : vector<64x16xf32> to vector<64xf32>
    %204 = vector.shape_cast %203 : vector<64xf32> to vector<64x1xf32>
    %205 = arith.addf %188, %204 : vector<64x1xf32>
    %206 = vector.extract_strided_slice %71 {offsets = [7, 0], sizes = [1, 16], strides = [1, 1]} : vector<10x16xf32> to vector<1x16xf32>
    %207 = vector.broadcast %206 : vector<1x16xf32> to vector<64x16xf32>
    %208 = arith.cmpf oeq, %84, %207 : vector<64x16xf32>
    %209 = arith.extui %208 : vector<64x16xi1> to vector<64x16xi32>
    %210 = arith.sitofp %209 : vector<64x16xi32> to vector<64x16xf32>
    %211 = vector.extract_strided_slice %82 {offsets = [7, 0], sizes = [1, 16], strides = [1, 1]} : vector<10x16xf32> to vector<1x16xf32>
    %212 = vector.broadcast %211 : vector<1x16xf32> to vector<64x16xf32>
    %213 = arith.mulf %210, %212 : vector<64x16xf32>
    %cst_37 = arith.constant dense<0.000000e+00> : vector<64xf32>
    %214 = vector.multi_reduction <add>, %213, %cst_37 [1] : vector<64x16xf32> to vector<64xf32>
    %215 = vector.shape_cast %214 : vector<64xf32> to vector<64x1xf32>
    %216 = arith.addf %199, %215 : vector<64x1xf32>
    %217 = vector.extract_strided_slice %76 {offsets = [7, 0], sizes = [1, 16], strides = [1, 1]} : vector<10x16xf32> to vector<1x16xf32>
    %218 = vector.broadcast %217 : vector<1x16xf32> to vector<64x16xf32>
    %219 = arith.mulf %213, %218 : vector<64x16xf32>
    %cst_38 = arith.constant dense<0.000000e+00> : vector<64xf32>
    %220 = vector.multi_reduction <add>, %219, %cst_38 [1] : vector<64x16xf32> to vector<64xf32>
    %221 = vector.shape_cast %220 : vector<64xf32> to vector<64x1xf32>
    %222 = arith.addf %205, %221 : vector<64x1xf32>
    %223 = vector.extract_strided_slice %71 {offsets = [8, 0], sizes = [1, 16], strides = [1, 1]} : vector<10x16xf32> to vector<1x16xf32>
    %224 = vector.broadcast %223 : vector<1x16xf32> to vector<64x16xf32>
    %225 = arith.cmpf oeq, %84, %224 : vector<64x16xf32>
    %226 = arith.extui %225 : vector<64x16xi1> to vector<64x16xi32>
    %227 = arith.sitofp %226 : vector<64x16xi32> to vector<64x16xf32>
    %228 = vector.extract_strided_slice %82 {offsets = [8, 0], sizes = [1, 16], strides = [1, 1]} : vector<10x16xf32> to vector<1x16xf32>
    %229 = vector.broadcast %228 : vector<1x16xf32> to vector<64x16xf32>
    %230 = arith.mulf %227, %229 : vector<64x16xf32>
    %cst_39 = arith.constant dense<0.000000e+00> : vector<64xf32>
    %231 = vector.multi_reduction <add>, %230, %cst_39 [1] : vector<64x16xf32> to vector<64xf32>
    %232 = vector.shape_cast %231 : vector<64xf32> to vector<64x1xf32>
    %233 = arith.addf %216, %232 : vector<64x1xf32>
    %234 = vector.extract_strided_slice %76 {offsets = [8, 0], sizes = [1, 16], strides = [1, 1]} : vector<10x16xf32> to vector<1x16xf32>
    %235 = vector.broadcast %234 : vector<1x16xf32> to vector<64x16xf32>
    %236 = arith.mulf %230, %235 : vector<64x16xf32>
    %cst_40 = arith.constant dense<0.000000e+00> : vector<64xf32>
    %237 = vector.multi_reduction <add>, %236, %cst_40 [1] : vector<64x16xf32> to vector<64xf32>
    %238 = vector.shape_cast %237 : vector<64xf32> to vector<64x1xf32>
    %239 = arith.addf %222, %238 : vector<64x1xf32>
    %240 = vector.extract_strided_slice %71 {offsets = [9, 0], sizes = [1, 16], strides = [1, 1]} : vector<10x16xf32> to vector<1x16xf32>
    %241 = vector.broadcast %240 : vector<1x16xf32> to vector<64x16xf32>
    %242 = arith.cmpf oeq, %84, %241 : vector<64x16xf32>
    %243 = arith.extui %242 : vector<64x16xi1> to vector<64x16xi32>
    %244 = arith.sitofp %243 : vector<64x16xi32> to vector<64x16xf32>
    %245 = vector.extract_strided_slice %82 {offsets = [9, 0], sizes = [1, 16], strides = [1, 1]} : vector<10x16xf32> to vector<1x16xf32>
    %246 = vector.broadcast %245 : vector<1x16xf32> to vector<64x16xf32>
    %247 = arith.mulf %244, %246 : vector<64x16xf32>
    %cst_41 = arith.constant dense<0.000000e+00> : vector<64xf32>
    %248 = vector.multi_reduction <add>, %247, %cst_41 [1] : vector<64x16xf32> to vector<64xf32>
    %249 = vector.shape_cast %248 : vector<64xf32> to vector<64x1xf32>
    %250 = arith.addf %233, %249 : vector<64x1xf32>
    %251 = vector.extract_strided_slice %76 {offsets = [9, 0], sizes = [1, 16], strides = [1, 1]} : vector<10x16xf32> to vector<1x16xf32>
    %252 = vector.broadcast %251 : vector<1x16xf32> to vector<64x16xf32>
    %253 = arith.mulf %247, %252 : vector<64x16xf32>
    %cst_42 = arith.constant dense<0.000000e+00> : vector<64xf32>
    %254 = vector.multi_reduction <add>, %253, %cst_42 [1] : vector<64x16xf32> to vector<64xf32>
    %255 = vector.shape_cast %254 : vector<64xf32> to vector<64x1xf32>
    %256 = arith.addf %239, %255 : vector<64x1xf32>
    %257 = tpu.iota {dimensions = array<i32: 1>} : vector<64x64xi32>
    %258 = arith.sitofp %257 : vector<64x64xi32> to vector<64x64xf32>
    %259 = vector.broadcast %256 : vector<64x1xf32> to vector<64x64xf32>
    %260 = arith.subf %258, %259 : vector<64x64xf32>
    %261 = math.absf %260 : vector<64x64xf32>
    %cst_43 = arith.constant 1.000000e+00 : f32
    %262 = vector.broadcast %cst_43 : f32 to vector<64x64xf32>
    %263 = arith.subf %262, %261 : vector<64x64xf32>
    %cst_44 = arith.constant 0.000000e+00 : f32
    %264 = vector.broadcast %cst_44 : f32 to vector<64x64xf32>
    %265 = arith.maximumf %264, %263 : vector<64x64xf32>
    %266 = vector.broadcast %250 : vector<64x1xf32> to vector<64x64xf32>
    %267 = arith.mulf %266, %265 : vector<64x64xf32>
    %c0_45 = arith.constant 0 : index
    %c0_46 = arith.constant 0 : index
    %268 = vector.load %arg0[%c0_45, %c0_46] : memref<64x16xf32, #tpu.memory_space<vmem>>, vector<64x16xf32>
    %cst_47 = arith.constant dense<0.000000e+00> : vector<64x16xf32>
    %269 = tpu.matmul %267, %268, %cst_47 {dimension_numbers = #tpu.dot_dimension_numbers<[1], [0], [0], [1], [0, 0, 1, 1], [], []>} : vector<64x64xf32>, vector<64x16xf32>, vector<64x16xf32> -> vector<64x16xf32>
    %c0_48 = arith.constant 0 : index
    %c0_49 = arith.constant 0 : index
    %270 = vector.load %arg2[%c0_48, %c0_49] : memref<64x16xf32, #tpu.memory_space<vmem>>, vector<64x16xf32>
    tpu.vector_store %arg2[%c0_48, %c0_49], %269 {strides = array<i32>} : memref<64x16xf32, #tpu.memory_space<vmem>>, vector<64x16xf32>,
    return
  }
}

</mosaic_0001>

<bundles_post_ra>
// kernel: interp_lnr_forward.1
= control target key start
LH: loop header
LB: loop body
LE: loop exit
PB: predicated region body
PF: predicated region fallthrough
CT: control target
= control target key end

     0   :  { %v17_v0 = vlaneseq  ;;  %v1952_v1 = vmov 16   ;;  %v3524_v9 = vmov 0.0   ;;  %vm76_vm12 = vcmask 80896   ;;  %s3519_s1 = inlined_call_operand.vmem [shape: f32[10,19], index: 1, kind: input, shape index: {}]   ;;  %s3520_s0 = inlined_call_operand.vmem [shape: f32[64,16], index: 0, kind: input, shape index: {}]   ;;  %s3521_s2 = inlined_call_operand.vmem [shape: f32[64,16], index: 2, kind: output, shape index: {}]  }
   0x1   :  { %1947 = vset.pattern.permute.xlu0 %v1952_v1  ;;  %v1975_v2 = vld [vmem:[%s3519_s1 + $0x8] sm:$0x3]  ;;  %1948 = vset.pattern.permute.xlu1 %v1952_v1  ;;  %v1985_v5 = vld [vmem:[%s3519_s1] sm:$0xff]  ;;  %v1954_v15 = vmov 17   ;;  %v1955_v16 = vmov 18   ;;  %vm83_vm15 = vcmask 1041408  }
   0x2   :  { %71 = vperm.xlu0 %1947, %v1975_v2   ;;  %v1978_v3 = vshrl.u32 %v17_v0, 7  ;;  %v1980_v4 = vand.u32 127, %v17_v0  ;;  %v1764_v7 = vadd.f32 -1.0, %v1975_v2  ;;  %v1763_v8 = vadd.f32 -1.0, %v1985_v5 }
   0x3   :  { %v369_v14 = vmul.f32 32.0, %v1975_v2  ;;  %v368_v17 = vmul.f32 32.0, %v1985_v5  ;;  %v1956_v21 = vmov 1.0   ;;  %v14_v24 = vfloor.f32 %v1975_v2 }
   0x4   :  { %3556 = vst [vmem:[#allocation2_spill] sm:$0xff] %v1980_v4  ;;  %vm24_vm0 = vcmp.lt.s32.totalorder %v1978_v3, 5  ;;  %vm31_vm1 = vcmp.lt.s32.totalorder %v1980_v4, 5  ;;  %vm34_vm2 = vcmp.lt.s32.totalorder %v1980_v4, %v1978_v3  ;;  %vm44_vm3 = vcmp.ge.s32.totalorder %v1978_v3, 5  ;;  %168 = vperm.xlu1 %1948, %v1763_v8  }
   0x5   :  { %vm32_vm4 = vmand %vm24_vm0, %vm31_vm1  ;;  %vm50_vm5 = vcmp.ge.s32.totalorder %v1980_v4, 5  ;;  %vm53_vm6 = vcmp.lt.s32.totalorder %v1980_v4, 10  ;;  %v1995_v6 = vadd.s32 8, %v1978_v3  ;;  %v16_v26 = vsub.f32 %v1975_v2, %v14_v24 }
   0x6   :  { %66 = vperm.xlu0 %1947, %v1985_v5   ;;  %vm36_vm7 = vmand %vm32_vm4, %vm34_vm2  ;;  %v2039_v29 = vfloor.f32 %v1985_v5  ;;  %v394_v49 = vadd.s32 32, %v1978_v3  ;;  %v395_v52 = vadd.s32 40, %v1978_v3  ;;  %v2080_v53 = vsub.s32 0, %v1978_v3 }
   0x7   :  { %vm51_vm8 = vmand %vm44_vm3, %vm50_vm5  ;;  %vm47_vm9 = vcmp.lt.s32.totalorder %v1995_v6, 10  ;;  %v1757_v10 = vsel %vm36_vm7, 1.0, %v3524_v9  ;;  %vm35_vm0 = vcmp.lt.s32.totalorder %v1980_v4, %v1995_v6  ;;  %vm194_vm3 = vcmp.lt.s32.totalorder %v1978_v3, %v1980_v4 }
   0x8   :  { %vm54_vm10 = vmand %vm51_vm8, %vm53_vm6  ;;  %1949 = vset.pattern.permute.xlu1 %v1954_v15  ;;  %v2089_v57 = vcvt.s32.f32 %v394_v49  ;;  %v2092_v58 = vcvt.s32.f32 %v1978_v3  ;;  %v2094_v59 = vcvt.s32.f32 %v395_v52  ;;  %v2097_v60 = vcvt.s32.f32 %v1995_v6 }
   0x9   :  { %vm56_vm11 = vmand %vm54_vm10, %vm34_vm2  ;;  %179 = vperm.xlu1 %1949, %v1763_v8   ;;  %vm195_vm2 = vcmp.lt.s32.totalorder %v1995_v6, %v1980_v4  ;;  %v2100_v61 = vsub.s32 1, %v1978_v3 }
   0xa   :  { %173 = vperm.xlu0 %1947, %v1764_v7   ;;  %v1758_v11 = vsel %vm56_vm11, 1.0, %v3524_v9  ;;  %vm52_vm13 = vmand %vm47_vm9, %vm50_vm5  ;;  %vm200_vm9 = vcmask 130048   ;;  %vm362_vm11 = vcmask 123904  }
   0xb   :  { %v62_v12 = vadd.f32 %v1758_v11, %v1757_v10  ;;  %vm2017_vm14 = vmand %vm52_vm13, %vm53_vm6 }
   0xc   :  { %vm57_vm1 = vmand %vm2017_vm14, %vm35_vm0 }
   0xd   :  { %1897 = vmatprep.mubr.msk.f32.mxu0 %vm76_vm12, %v62_v12  ;;  %183 = vperm.xlu1 %1949, %v1764_v7   ;;  %v1759_v20 = vsel %vm57_vm1, 1.0, %v3524_v9 }
   0xe   :  { %1951 = vset.pattern.permute.xlu0 %v1955_v16 }
   0xf   :  { %377 = vperm.xlu0 %1951, %v369_v14  }
  0x11   :  { %1950 = vset.pattern.permute.xlu1 %v1955_v16 }
  0x12   :  { %372 = vperm.xlu1 %1950, %v368_v17  }
  0x7d   :  { %v72_v18 = vpop.permute.xlu0 %71 }
  0x7e   :  { %1893 = vmatprep.subr.msk.mxu0 %vm83_vm15, %v72_v18 }
  0x7f   :  { %1894 = vmatpush3.msk.msra.mxu0 %vm83_vm15, %v72_v18  ;;  %v169_v22 = vpop.permute.xlu1 %168 }
  0x80   :  { %vm176_vm7 = vcmp.lt.f32.partialorder %v2039_v29, %v169_v22 }
  0x81   :  { %v67_v19 = vpop.permute.xlu0 %66 }
  0x82   :  { %1895 = vmatprep.subr.mxu0 %v67_v19 }
  0x83   :  { %1896 = vmatpush3.msra.mxu0 %v67_v19 }
  0x84   :  { %1898 = vmatmul.mubr.msk.f32.vlgmr.msra.gmra.mxu0 %vm76_vm12, %v1759_v20  ;;  %1900 = vmatprep.subr.msk.mxu0 %vm195_vm2, %v1956_v21  ;;  %v180_v23 = vpop.permute.xlu1 %179 }
  0x85   :  { %1901 = vmatpush3.msk.msra.mxu0 %vm195_vm2, %v1956_v21  ;;  %v174_v25 = vpop.permute.xlu0 %173 }
  0x86   :  { %1902 = vmatprep.subr.msk.mxu0 %vm194_vm3, %v1956_v21  ;;  %vm177_vm4 = vcmp.lt.f32.partialorder %v14_v24, %v174_v25 }
  0x87   :  { %1903 = vmatpush3.msk.msra.mxu0 %vm194_vm3, %v1956_v21 }
  0x88   :  { %v184_v28 = vpop.permute.xlu1 %183 }
  0x8a   :  { %v378_v45 = vpop.permute.xlu0 %377 }
  0x8d   :  { %v2073_v44 = vpop.permute.xlu1 %372 }
 0x144   :  { %v1899_v27 = vpop.f32.mrf.mxu0 }
 0x145   :  { %v163_v30 = vadd.f32 %v1899_v27, %v14_v24 }
 0x146   :  { %v153_v31 = vpop.f32.mrf.mxu0 }
 0x147   :  { %v2041_v32 = vadd.f32 %v163_v30, %v16_v26  ;;  %vm187_vm5 = vcmp.lt.f32.partialorder %v163_v30, %v184_v28  ;;  %v2044_v33 = vadd.f32 %v153_v31, %v2039_v29 }
 0x148   :  { %vm2046_vm6 = vmand %vm177_vm4, %vm187_vm5 }
 0x149   :  { %vm186_vm8 = vcmp.lt.f32.partialorder %v2044_v33, %v180_v23  ;;  %v1766_v35 = vsel %vm2046_vm6, 1.0, %v3524_v9  ;;  %v393_v23 = vadd.s32 24, %v1978_v3 }
 0x14a   :  { %vm2055_vm10 = vmand %vm176_vm7, %vm186_vm8  ;;  %1907 = vmatprep.subr.msk.mxu0 %vm83_vm15, %v1766_v35 }
 0x14b   :  { %v1765_v37 = vsel %vm2055_vm10, 1.0, %v3524_v9 }
 0x14c   :  { %1904 = vmatprep.mubr.msk.f32.mxu0 %vm200_vm9, %v1765_v37 }
 0x14d   :  { %1905 = vmatmul.mubr.msk.f32.vlgmr.msra.gmra.mxu0 %vm200_vm9, %v1766_v35 }
 0x14e   :  { %1908 = vmatpush3.msk.msra.mxu0 %vm83_vm15, %v1766_v35  ;;  %1911 = vmatprep.mubr.msk.f32.mxu0 %vm76_vm12, %v62_v12  ;;  %v392_v12 = vadd.s32 16, %v1978_v3 }
 0x14f   :  { %1909 = vmatprep.subr.msk.mxu0 %vm2055_vm10, %v1956_v21 }
 0x150   :  { %1910 = vmatpush3.msk.msra.mxu0 %vm2055_vm10, %v1956_v21  ;;  %v385_v21 = vadd.f32 %v2041_v32, %v378_v45  ;;  %v2157_v22 = vcvt.s32.f32 %v392_v12  ;;  %v2177_v32 = vcvt.s32.f32 %v393_v23 }
 0x151   :  { %1912 = vmatmul.mubr.msk.f32.vlgmr.msra.gmra.mxu0 %vm76_vm12, %v1759_v20 }
 0x152   :  { %v2169_v30 = vrot.slane %v385_v21, %v2080_v53  ;;  %v2214_v52 = vrot.slane %v385_v21, %v2100_v61 }
 0x20d   :  { %v1906_v38 = vpop.f32.mrf.mxu0 }
 0x20f   :  { %v273_v39 = vpop.f32.mrf.mxu0 }
 0x211   :  { %v1913_v40 = vpop.f32.mrf.mxu0 }
 0x212   :  { %v363_v41 = vsel %vm362_vm11, %v1913_v40, 0.0 }
 0x213   :  { %364 = vadd.xlane.f32.xlu1 %v363_v41  ;;  %v350_v42 = vpop.f32.mrf.mxu0 }
 0x214   :  { %v359_v43 = vsel %vm200_vm9, %v350_v42, 0.0 }
 0x215   :  { %360 = vadd.xlane.f32.xlu0 %v359_v43 }
 0x29c   :  { %v365_v46 = vpop.xlane.xlu1 %364 }
 0x29d   :  { %v367_v47 = vadd.f32 %v1906_v38, %v365_v46 }
 0x29e   :  { %v361_v48 = vpop.xlane.xlu0 %360 }
 0x29f   :  { %v381_v50 = vadd.f32 %v378_v45, %v367_v47  ;;  %vm387_vm12 = vcmp.lt.f32.partialorder %v367_v47, 32.0  ;;  %v366_v51 = vadd.f32 %v361_v48, %v273_v39 }
 0x2a0   :  { %vm389_vm13 = vmand %vm2046_vm6, %vm387_vm12 }
 0x2a1   :  { %v391_v54 = vsel %vm389_vm13, 1.0, %v3524_v9  ;;  %v2084_v55 = vadd.f32 %v2073_v44, %v366_v51  ;;  %vm386_vm14 = vcmp.lt.f32.partialorder %v366_v51, 32.0  ;;  %v2087_v56 = vrot.slane %v381_v50, %v2080_v53 }
 0x2a2   :  { %vm388_vm15 = vmand %vm2055_vm10, %vm386_vm14  ;;  %v2105_v62 = vrot.slane %v391_v54, %v2080_v53  ;;  %v2108_v63 = vrot.slane %v381_v50, %v2100_v61  ;;  %v2135_v13 = vrot.slane %v391_v54, %v2100_v61  ;;  %v2221_v54 = vsub.s32 4, %v1978_v3 }
 0x2a3   :  { %v2112_v0 = vrot.slane %v2084_v55, %v2080_v53  ;;  %v2115_v1 = vsel %vm388_vm15, 1.0, %v3524_v9  ;;  %vm1342_vm0 = vcmp.eq.f32.partialorder %v2089_v57, %v2087_v56  ;;  %vm1338_vm1 = vcmp.eq.f32.partialorder %v2092_v58, %v2087_v56 }
 0x2a4   :  { %3563 = vst [vmem:[#allocation3_spill] sm:$0xff] %v2108_v63  ;;  %vm1343_vm2 = vcmp.eq.f32.partialorder %v2094_v59, %v2087_v56  ;;  %v1845_v2 = vsel %vm1342_vm0, 1.0, %v3524_v9  ;;  %v1841_v6 = vsel %vm1338_vm1, 1.0, %v3524_v9  ;;  %vm1339_vm3 = vcmp.eq.f32.partialorder %v2097_v60, %v2087_v56  ;;  %3564 = vst [vmem:[#allocation4_spill] sm:$0xff] %v2135_v13 }
 0x2a5   :  { %v1846_v7 = vsel %vm1343_vm2, 1.0, %v3524_v9  ;;  %v2129_v8 = vmul.f32 %v1845_v2, %v2105_v62  ;;  %v1366_v10 = vmul.f32 %v1841_v6, %v2105_v62  ;;  %v1842_v11 = vsel %vm1339_vm3, 1.0, %v3524_v9 }
 0x2a6   :  { %v2139_v14 = vrot.slane %v2115_v1, %v2080_v53  ;;  %vm1454_vm4 = vcmp.eq.f32.partialorder %v2092_v58, %v2108_v63  ;;  %vm410_vm5 = vcmp.eq.f32.partialorder %v2092_v58, %v2112_v0  ;;  %v2149_v17 = vmul.f32 %v1846_v7, %v2105_v62 }
 0x2a7   :  { %v1386_v15 = vsel %vm200_vm9, %v2129_v8, 0.0  ;;  %v1374_v16 = vsel %vm200_vm9, %v1366_v10, 0.0  ;;  %v1367_v18 = vmul.f32 %v1842_v11, %v2105_v62  ;;  %v1849_v19 = vsel %vm1454_vm4, 1.0, %v3524_v9 }
 0x2a8   :  { %1387 = vadd.xlane.f32.xlu1 %v1386_v15  ;;  %1375 = vadd.xlane.f32.xlu0 %v1374_v16  ;;  %v1777_v20 = vsel %vm410_vm5, 1.0, %v3524_v9  ;;  %vm1455_vm6 = vcmp.eq.f32.partialorder %v2097_v60, %v2108_v63  ;;  %v1389_v24 = vsel %vm200_vm9, %v2149_v17, 0.0  ;;  %v1482_v26 = vmul.f32 %v1849_v19, %v2135_v13 }
 0x2a9   :  { %v1377_v25 = vsel %vm200_vm9, %v1367_v18, 0.0  ;;  %v2165_v27 = vmul.f32 %v1777_v20, %v2139_v14  ;;  %v1850_v28 = vsel %vm1455_vm6, 1.0, %v3524_v9  ;;  %v2173_v31 = vrot.slane %v2084_v55, %v2100_v61 }
 0x2aa   :  { %vm1340_vm7 = vcmp.eq.f32.partialorder %v2157_v22, %v2087_v56  ;;  %v1490_v34 = vsel %vm200_vm9, %v1482_v26, 0.0  ;;  %v1483_v36 = vmul.f32 %v1850_v28, %v2135_v13  ;;  %v1410_v37 = vmul.f32 %v2169_v30, %v1366_v10 }
 0x2ab   :  { %v446_v35 = vsel %vm200_vm9, %v2165_v27, 0.0  ;;  %v1843_v38 = vsel %vm1340_vm7, 1.0, %v3524_v9  ;;  %vm1341_vm8 = vcmp.eq.f32.partialorder %v2177_v32, %v2087_v56  ;;  %vm530_vm10 = vcmp.eq.f32.partialorder %v2089_v57, %v2173_v31 }
 0x2ac   :  { %1390 = vadd.xlane.f32.xlu1 %v1389_v24  ;;  %1378 = vadd.xlane.f32.xlu0 %v1377_v25  ;;  %v2191_v39 = vrot.slane %v2115_v1, %v2100_v61  ;;  %v1493_v40 = vsel %vm200_vm9, %v1483_v36, 0.0  ;;  %v1418_v41 = vsel %vm200_vm9, %v1410_v37, 0.0  ;;  %v2196_v42 = vmul.f32 %v1843_v38, %v2105_v62 }
 0x2ad   :  { %v1411_v43 = vmul.f32 %v2169_v30, %v1367_v18  ;;  %v1844_v45 = vsel %vm1341_vm8, 1.0, %v3524_v9  ;;  %v1789_v46 = vsel %vm530_vm10, 1.0, %v3524_v9  ;;  %vm1456_vm11 = vcmp.eq.f32.partialorder %v2157_v22, %v2108_v63 }
 0x2ae   :  { %v1380_v47 = vsel %vm200_vm9, %v2196_v42, 0.0  ;;  %v2207_v49 = vmul.f32 %v1844_v45, %v2105_v62  ;;  %v2210_v50 = vmul.f32 %v1789_v46, %v2191_v39  ;;  %v1851_v51 = vsel %vm1456_vm11, 1.0, %v3524_v9 }
 0x2af   :  { %v1421_v48 = vsel %vm200_vm9, %v1411_v43, 0.0  ;;  %vm1457_vm12 = vcmp.eq.f32.partialorder %v2177_v32, %v2108_v63  ;;  %vm531_vm13 = vcmp.eq.f32.partialorder %v2094_v59, %v2173_v31  ;;  %v2228_v7 = vmul.f32 %v1851_v51, %v2135_v13 }
 0x2b0   :  { %1491 = vadd.xlane.f32.xlu0 %v1490_v34  ;;  %447 = vadd.xlane.f32.xlu1 %v446_v35  ;;  %3565 = vst [vmem:[#allocation5_spill] sm:$0xff] %v2210_v50  ;;  %v1383_v2 = vsel %vm200_vm9, %v2207_v49, 0.0  ;;  %v574_v6 = vsel %vm200_vm9, %v2210_v50, 0.0  ;;  %v1526_v10 = vmul.f32 %v2214_v52, %v1482_v26  ;;  %v1852_v11 = vsel %vm1457_vm12, 1.0, %v3524_v9 }
 0x2b1   :  { %v1790_v12 = vsel %vm531_vm13, 1.0, %v3524_v9  ;;  %v2235_v15 = vrot.slane %v2084_v55, %v2221_v54  ;;  %vm526_vm14 = vcmp.eq.f32.partialorder %v2092_v58, %v2173_v31  ;;  %v2240_v16 = vsub.s32 6, %v1978_v3 }
 0x2b2   :  { %v1496_v18 = vsel %vm200_vm9, %v2228_v7, 0.0  ;;  %v1534_v19 = vsel %vm200_vm9, %v1526_v10, 0.0  ;;  %v2246_v20 = vmul.f32 %v1852_v11, %v2135_v13  ;;  %v2249_v21 = vmul.f32 %v1790_v12, %v2191_v39 }
 0x2b3   :  { %v1785_v23 = vsel %vm526_vm14, 1.0, %v3524_v9  ;;  %v2254_v24 = vrot.slane %v2084_v55, %v2240_v16  ;;  %vm411_vm15 = vcmp.eq.f32.partialorder %v2097_v60, %v2112_v0  ;;  %vm876_vm0 = vcmp.eq.f32.partialorder %v2157_v22, %v2235_v15 }
 0x2b4   :  { %1494 = vadd.xlane.f32.xlu0 %v1493_v40  ;;  %1419 = vadd.xlane.f32.xlu1 %v1418_v41  ;;  %3566 = vst [vmem:[#allocation6_spill] sm:$0xff] %v2249_v21  ;;  %v15_v25 = vsub.f32 %v1985_v5, %v2039_v29  ;;  %v640_v26 = vsub.s32 2, %v1978_v3  ;;  %v2265_v28 = vrot.slane %v2115_v1, %v2221_v54  ;;  %v1499_v34 = vsel %vm200_vm9, %v2246_v20, 0.0 }
 0x2b5   :  { %v577_v35 = vsel %vm200_vm9, %v2249_v21, 0.0  ;;  %v2272_v37 = vmul.f32 %v1785_v23, %v2191_v39  ;;  %v1527_v38 = vmul.f32 %v2214_v52, %v1483_v36  ;;  %v1778_v5 = vsel %vm411_vm15, 1.0, %v3524_v9 }
 0x2b6   :  { %v1811_v29 = vsel %vm876_vm0, 1.0, %v3524_v9  ;;  %v2278_v40 = vrot.slane %v2084_v55, %v640_v26  ;;  %vm527_vm1 = vcmp.eq.f32.partialorder %v2097_v60, %v2173_v31  ;;  %vm1106_vm2 = vcmp.eq.f32.partialorder %v2092_v58, %v2254_v24 }
 0x2b7   :  { %v382_v41 = vadd.f32 %v2044_v33, %v15_v25  ;;  %v2287_v36 = vrot.slane %v2115_v1, %v2240_v16  ;;  %v562_v43 = vsel %vm200_vm9, %v2272_v37, 0.0  ;;  %v1537_v45 = vsel %vm200_vm9, %v1527_v38, 0.0 }
 0x2b8   :  { %1381 = vadd.xlane.f32.xlu0 %v1380_v47  ;;  %1422 = vadd.xlane.f32.xlu1 %v1421_v48  ;;  %v2293_v46 = vmul.f32 %v1778_v5, %v2139_v14  ;;  %v2296_v47 = vmul.f32 %v1811_v29, %v2265_v28  ;;  %v1786_v48 = vsel %vm527_vm1, 1.0, %v3524_v9  ;;  %v1825_v33 = vsel %vm1106_vm2, 1.0, %v3524_v9 }
 0x2b9   :  { %v756_v51 = vsub.s32 3, %v1978_v3  ;;  %vm642_vm3 = vcmp.eq.f32.partialorder %v2092_v58, %v2278_v40  ;;  %v2310_v10 = vrot.slane %v2115_v1, %v640_v26  ;;  %vm414_vm4 = vcmp.eq.f32.partialorder %v2089_v57, %v2112_v0 }
 0x2ba   :  { %3567 = vst [vmem:[#allocation7_spill] sm:$0xff] %v2296_v47  ;;  %v449_v11 = vsel %vm200_vm9, %v2293_v46, 0.0  ;;  %v916_v12 = vsel %vm200_vm9, %v2296_v47, 0.0  ;;  %v1793_v23 = vsel %vm642_vm3, 1.0, %v3524_v9  ;;  %vm643_vm5 = vcmp.eq.f32.partialorder %v2097_v60, %v2278_v40 }
 0x2bb   :  { %v1781_v25 = vsel %vm414_vm4, 1.0, %v3524_v9  ;;  %vm877_vm6 = vcmp.eq.f32.partialorder %v2177_v32, %v2235_v15  ;;  %vm412_vm7 = vcmp.eq.f32.partialorder %v2157_v22, %v2112_v0  ;;  %vm415_vm8 = vcmp.eq.f32.partialorder %v2094_v59, %v2112_v0 }
 0x2bc   :  { %1384 = vadd.xlane.f32.xlu0 %v1383_v2  ;;  %575 = vadd.xlane.f32.xlu1 %v574_v6  ;;  %v2304_v2 = vadd.f32 %v382_v41, %v2073_v44  ;;  %v2307_v6 = vsub.s32 5, %v1978_v3  ;;  %v2322_v44 = vmul.f32 %v1825_v33, %v2287_v36  ;;  %v2337_v38 = vmul.f32 %v1781_v25, %v2139_v14 }
 0x2bd   :  { %v2362_v33 = vrot.slane %v2084_v55, %v756_v51  ;;  %vm1107_vm10 = vcmp.eq.f32.partialorder %v2097_v60, %v2254_v24  ;;  %vm528_vm11 = vcmp.eq.f32.partialorder %v2157_v22, %v2173_v31  ;;  %v1782_v25 = vsel %vm415_vm8, 1.0, %v3524_v9 }
 0x2be   :  { %3568 = vst [vmem:[#allocation8_spill] sm:$0xff] %v2322_v44  ;;  %v2340_v5 = vrot.slane %v2304_v2, %v640_v26  ;;  %v2343_v29 = vrot.slane %v2304_v2, %v756_v51  ;;  %v2347_v41 = vrot.slane %v2304_v2, %v2221_v54  ;;  %v2358_v26 = vmul.f32 %v1793_v23, %v2310_v10 }
 0x2bf   :  { %v1812_v54 = vsel %vm877_vm6, 1.0, %v3524_v9  ;;  %v2400_v4 = vrot.slane %v2304_v2, %v2240_v16  ;;  %vm758_vm12 = vcmp.eq.f32.partialorder %v2092_v58, %v2362_v33  ;;  %v2415_v16 = vrot.slane %v2115_v1, %v756_v51 }
 0x2c0   :  { %1497 = vadd.xlane.f32.xlu0 %v1496_v18  ;;  %1535 = vadd.xlane.f32.xlu1 %v1534_v19  ;;  %v2319_v18 = vmul.f32 %v1786_v48, %v2191_v39  ;;  %v2325_v19 = vsub.s32 7, %v1978_v3  ;;  %v1794_v48 = vsel %vm643_vm5, 1.0, %v3524_v9  ;;  %vm646_vm14 = vcmp.eq.f32.partialorder %v2089_v57, %v2278_v40 }
 0x2c1   :  { %v2376_v23 = vmul.f32 %v1794_v48, %v2310_v10  ;;  %v2396_v48 = vrot.slane %v2304_v2, %v2307_v6  ;;  %vm647_vm15 = vcmp.eq.f32.partialorder %v2094_v59, %v2278_v40  ;;  %vm413_vm1 = vcmp.eq.f32.partialorder %v2177_v32, %v2112_v0 }
 0x2c2   :  { %vm762_vm3 = vcmp.eq.f32.partialorder %v2089_v57, %v2362_v33  ;;  %vm529_vm5 = vcmp.eq.f32.partialorder %v2177_v32, %v2173_v31  ;;  %vm759_vm8 = vcmp.eq.f32.partialorder %v2097_v60, %v2362_v33 }
 0x2c4   :  { %1500 = vadd.xlane.f32.xlu0 %v1499_v34  ;;  %578 = vadd.xlane.f32.xlu1 %v577_v35  ;;  %v1412_v34 = vmul.f32 %v2169_v30, %v2196_v42  ;;  %v396_v35 = vadd.s32 48, %v1978_v3  ;;  %v2351_v42 = vmul.f32 %v2169_v30, %v2129_v8 }
 0x2c6   :  { %v1424_v8 = vsel %vm200_vm9, %v1412_v34, 0.0  ;;  %v678_v34 = vsel %vm200_vm9, %v2358_v26, 0.0 }
 0x2c8   :  { %563 = vadd.xlane.f32.xlu0 %v562_v43  ;;  %1538 = vadd.xlane.f32.xlu1 %v1537_v45  ;;  %v565_v43 = vsel %vm200_vm9, %v2319_v18, 0.0  ;;  %v1142_v45 = vsel %vm200_vm9, %v2322_v44, 0.0 }
 0x2cc   :  { %450 = vadd.xlane.f32.xlu0 %v449_v11  ;;  %917 = vadd.xlane.f32.xlu1 %v916_v12  ;;  %v2372_v11 = vcvt.s32.f32 %v396_v35  ;;  %v397_v12 = vadd.s32 56, %v1978_v3  ;;  %v2388_v35 = vmul.f32 %v1812_v54, %v2265_v28  ;;  %v1779_v3 = vsel %vm412_vm7, 1.0, %v3524_v9 }
 0x2cd   :  { %v2407_v54 = vrot.slane %v2084_v55, %v2307_v6 }
 0x2ce   :  { %3570 = vst [vmem:[#allocation10_spill] sm:$0xff] %v2388_v35  ;;  %vm532_vm13 = vcmp.eq.f32.partialorder %v2372_v11, %v2173_v31  ;;  %v2412_v44 = vcvt.s32.f32 %v397_v12  ;;  %v3572_v12 = vmov 0.0   ;;  %vm416_vm0 = vcmp.eq.f32.partialorder %v2372_v11, %v2112_v0 }
 0x2cf   :  { %v1801_v50 = vsel %vm758_vm12, 1.0, %v3572_v12  ;;  %v1797_v51 = vsel %vm646_vm14, 1.0, %v3572_v12  ;;  %v1791_v13 = vsel %vm532_vm13, 1.0, %v3572_v12  ;;  %vm992_vm2 = vcmp.eq.f32.partialorder %v2157_v22, %v2407_v54 }
 0x2d0   :  { %566 = vadd.xlane.f32.xlu0 %v565_v43  ;;  %1143 = vadd.xlane.f32.xlu1 %v1142_v45  ;;  %v2383_v43 = vmul.f32 %v2169_v30, %v2149_v17  ;;  %v2392_v45 = vmul.f32 %v1782_v25, %v2139_v14  ;;  %v1826_v17 = vsel %vm1107_vm10, 1.0, %v3524_v9  ;;  %v1787_v25 = vsel %vm528_vm11, 1.0, %v3524_v9 }
 0x2d1   :  { %v919_v9 = vsel %vm200_vm9, %v2388_v35, 0.0  ;;  %v2427_v21 = vmul.f32 %v1826_v17, %v2287_v36  ;;  %v2432_v47 = vmul.f32 %v1787_v25, %v2191_v39  ;;  %v2442_v17 = vrot.slane %v2115_v1, %v2307_v6 }
 0x2d2   :  { %3569 = vst [vmem:[#allocation9_spill] sm:$0xff] %v2383_v43  ;;  %v2438_v43 = vmul.f32 %v1797_v51, %v2310_v10  ;;  %v2446_v35 = vrot.slane %v2084_v55, %v2325_v19  ;;  %v1798_v6 = vsel %vm647_vm15, 1.0, %v3572_v12  ;;  %v2463_v25 = vmul.f32 %v1791_v13, %v2191_v39 }
 0x2d3   :  { %3571 = vst [vmem:[#allocation11_spill] sm:$0xff] %v2427_v21  ;;  %v1145_v55 = vsel %vm200_vm9, %v2427_v21, 0.0  ;;  %v1783_v51 = vsel %vm416_vm0, 1.0, %v3572_v12  ;;  %v568_v63 = vsel %vm200_vm9, %v2432_v47, 0.0  ;;  %v1780_v13 = vsel %vm413_vm1, 1.0, %v3572_v12 }
 0x2d4   :  { %679 = vadd.xlane.f32.xlu0 %v678_v34  ;;  %1425 = vadd.xlane.f32.xlu1 %v1424_v8  ;;  %v681_v8 = vsel %vm200_vm9, %v2376_v23, 0.0  ;;  %v2420_v34 = vmul.f32 %v1779_v3, %v2139_v14  ;;  %v1413_v3 = vmul.f32 %v2169_v30, %v2207_v49  ;;  %3573 = vst [vmem:[#allocation12_spill] sm:$0xff] %v2438_v43  ;;  %3574 = vst [vmem:[#allocation13_spill] sm:$0xff] %v2446_v35 }
 0x2d5   :  { %v2455_v49 = vmul.f32 %v1801_v50, %v2415_v16  ;;  %3575 = vst [vmem:[#allocation14_spill] sm:$0xff] %v2463_v25  ;;  %v2471_v50 = vrot.slane %v2115_v1, %v2325_v19  ;;  %v2477_v21 = vmul.f32 %v1783_v51, %v2139_v14  ;;  %vm1344_vm4 = vcmp.eq.f32.partialorder %v2372_v11, %v2087_v56 }
 0x2d6   :  { %v1427_v43 = vsel %vm200_vm9, %v1413_v3, 0.0  ;;  %vm1222_vm6 = vcmp.eq.f32.partialorder %v2092_v58, %v2446_v35  ;;  %v1805_v3 = vsel %vm762_vm3, 1.0, %v3572_v12  ;;  %vm417_vm7 = vcmp.eq.f32.partialorder %v2412_v44, %v2112_v0 }
 0x2d7   :  { %3577 = vst [vmem:[#allocation16_spill] sm:$0xff] %v2471_v50  ;;  %3578 = vst [vmem:[#allocation17_spill] sm:$0xff] %v2477_v21  ;;  %v794_v1 = vsel %vm200_vm9, %v2455_v49, 0.0  ;;  %v2502_v51 = vmul.f32 %v1780_v13, %v2139_v14  ;;  %v1819_v21 = vsel %vm992_vm2, 1.0, %v3572_v12  ;;  %vm763_vm10 = vcmp.eq.f32.partialorder %v2094_v59, %v2362_v33 }
 0x2d8   :  { %682 = vadd.xlane.f32.xlu0 %v681_v8  ;;  %920 = vadd.xlane.f32.xlu1 %v919_v9  ;;  %v452_v9 = vsel %vm200_vm9, %v2420_v34, 0.0  ;;  %v2466_v8 = vmul.f32 %v1798_v6, %v2310_v10  ;;  %v2496_v6 = vmul.f32 %v1805_v3, %v2415_v16  ;;  %v1788_v3 = vsel %vm529_vm5, 1.0, %v3572_v12 }
 0x2d9   :  { %vm1345_vm11 = vcmp.eq.f32.partialorder %v2412_v44, %v2087_v56  ;;  %vm648_vm12 = vcmp.eq.f32.partialorder %v2372_v11, %v2278_v40  ;;  %vm644_vm13 = vcmp.eq.f32.partialorder %v2157_v22, %v2278_v40  ;;  %vm533_vm14 = vcmp.eq.f32.partialorder %v2412_v44, %v2173_v31 }
 0x2da   :  { %3576 = vst [vmem:[#allocation15_spill] sm:$0xff] %v2466_v8  ;;  %3579 = vst [vmem:[#allocation18_spill] sm:$0xff] %v2496_v6  ;;  %v1848_v13 = vsel %vm1345_vm11, 1.0, %v3572_v12  ;;  %vm874_vm15 = vcmp.eq.f32.partialorder %v2092_v58, %v2235_v15  ;;  %vm993_vm0 = vcmp.eq.f32.partialorder %v2177_v32, %v2407_v54  ;;  %vm645_vm1 = vcmp.eq.f32.partialorder %v2177_v32, %v2278_v40 }
 0x2db   :  { %v2542_v56 = vmul.f32 %v1848_v13, %v2105_v62  ;;  %vm649_vm2 = vcmp.eq.f32.partialorder %v2412_v44, %v2278_v40  ;;  %v1792_v13 = vsel %vm533_vm14, 1.0, %v3572_v12  ;;  %vm1223_vm3 = vcmp.eq.f32.partialorder %v2097_v60, %v2446_v35 }
 0x2dc   :  { %453 = vadd.xlane.f32.xlu0 %v452_v9  ;;  %1146 = vadd.xlane.f32.xlu1 %v1145_v55  ;;  %v580_v9 = vsel %vm200_vm9, %v2463_v25, 0.0  ;;  %v1847_v55 = vsel %vm1344_vm4, 1.0, %v3572_v12  ;;  %v1784_v25 = vsel %vm417_vm7, 1.0, %v3572_v12  ;;  %v1796_v40 = vsel %vm645_vm1, 1.0, %v3572_v12 }
 0x2dd   :  { %v2506_v8 = vmul.f32 %v1847_v55, %v2105_v62  ;;  %v2513_v6 = vmul.f32 %v1784_v25, %v2139_v14  ;;  %v2529_v14 = vmul.f32 %v1819_v21, %v2442_v17  ;;  %v2538_v55 = vmul.f32 %v1788_v3, %v2191_v39  ;;  %3582 = vst [vmem:[#allocation21_spill] sm:$0xff] %v2542_v56 }
 0x2de   :  { %v1799_v21 = vsel %vm648_vm12, 1.0, %v3572_v12  ;;  %v455_v62 = vsel %vm200_vm9, %v2502_v51, 0.0  ;;  %vm875_vm4 = vcmp.eq.f32.partialorder %v2097_v60, %v2235_v15  ;;  %vm764_vm5 = vcmp.eq.f32.partialorder %v2372_v11, %v2362_v33 }
 0x2df   :  { %3580 = vst [vmem:[#allocation19_spill] sm:$0xff] %v2506_v8  ;;  %v2523_v0 = vmul.f32 %v2169_v30, %v2506_v8  ;;  %v1802_v8 = vsel %vm759_vm8, 1.0, %v3572_v12  ;;  %v1032_v3 = vsel %vm200_vm9, %v2529_v14, 0.0  ;;  %vm765_vm7 = vcmp.eq.f32.partialorder %v2412_v44, %v2362_v33 }
 0x2e0   :  { %569 = vadd.xlane.f32.xlu0 %v568_v63  ;;  %1428 = vadd.xlane.f32.xlu1 %v1427_v43  ;;  %v1833_v63 = vsel %vm1222_vm6, 1.0, %v3572_v12  ;;  %v1806_v43 = vsel %vm763_vm10, 1.0, %v3572_v12  ;;  %vm878_vm6 = vcmp.eq.f32.partialorder %v2089_v57, %v2235_v15  ;;  %vm760_vm8 = vcmp.eq.f32.partialorder %v2157_v22, %v2362_v33 }
 0x2e1   :  { %3581 = vst [vmem:[#allocation20_spill] sm:$0xff] %v2523_v0  ;;  %v2532_v25 = vmul.f32 %v1806_v43, %v2415_v16  ;;  %v2547_v43 = vrot.slane %v2304_v2, %v2325_v19  ;;  %v2550_v0 = vmul.f32 %v1833_v63, %v2471_v50  ;;  %v2567_v19 = vmul.f32 %v2169_v30, %v2542_v56 }
 0x2e2   :  { %v2572_v63 = vmul.f32 %v1802_v8, %v2415_v16  ;;  %v1528_v30 = vmul.f32 %v2214_v52, %v2228_v7  ;;  %v1795_v8 = vsel %vm644_vm13, 1.0, %v3572_v12  ;;  %vm990_vm10 = vcmp.eq.f32.partialorder %v2092_v58, %v2407_v54 }
 0x2e3   :  { %3583 = vst [vmem:[#allocation22_spill] sm:$0xff] %v2547_v43  ;;  %3584 = vst [vmem:[#allocation23_spill] sm:$0xff] %v2550_v0  ;;  %v1258_v31 = vsel %vm200_vm9, %v2550_v0, 0.0  ;;  %vm761_vm11 = vcmp.eq.f32.partialorder %v2177_v32, %v2362_v33  ;;  %vm996_vm12 = vcmp.eq.f32.partialorder %v2372_v11, %v2407_v54  ;;  %vm991_vm13 = vcmp.eq.f32.partialorder %v2097_v60, %v2407_v54 }
 0x2e4   :  { %795 = vadd.xlane.f32.xlu0 %v794_v1  ;;  %581 = vadd.xlane.f32.xlu1 %v580_v9  ;;  %v2553_v1 = vmul.f32 %v1799_v21, %v2310_v10  ;;  %v2557_v9 = vrot.slane %v2304_v2, %v2080_v53  ;;  %3586 = vst [vmem:[#allocation25_spill] sm:$0xff] %v2567_v19  ;;  %v571_v53 = vsel %vm200_vm9, %v2538_v55, 0.0  ;;  %v1800_v21 = vsel %vm649_vm2, 1.0, %v3572_v12 }
 0x2e5   :  { %v2596_v7 = vmul.f32 %v1800_v21, %v2310_v10  ;;  %v797_v0 = vsel %vm200_vm9, %v2572_v63, 0.0  ;;  %v1540_v21 = vsel %vm200_vm9, %v1528_v30, 0.0  ;;  %v2611_v19 = vmul.f32 %v1795_v8, %v2310_v10 }
 0x2e6   :  { %3585 = vst [vmem:[#allocation24_spill] sm:$0xff] %v2553_v1  ;;  %v2605_v56 = vmul.f32 %v2557_v9, %v2165_v27  ;;  %v2618_v1 = vmul.f32 %v1792_v13, %v2191_v39  ;;  %v2629_v30 = vmul.f32 %v1796_v40, %v2310_v10  ;;  %v1810_v8 = vsel %vm875_vm4, 1.0, %v3572_v12 }
 0x2e7   :  { %3587 = vst [vmem:[#allocation26_spill] sm:$0xff] %v2596_v7  ;;  %v2615_v7 = vrot.slane %v2304_v2, %v2100_v61  ;;  %v2645_v2 = vmul.f32 %v2557_v9, %v2293_v46  ;;  %v684_v10 = vsel %vm200_vm9, %v2611_v19, 0.0  ;;  %v2658_v40 = vmul.f32 %v1810_v8, %v2265_v28 }
 0x2e8   :  { %456 = vadd.xlane.f32.xlu0 %v455_v62  ;;  %1033 = vadd.xlane.f32.xlu1 %v1032_v3  ;;  %v1809_v62 = vsel %vm874_vm15, 1.0, %v3572_v12  ;;  %v1820_v3 = vsel %vm993_vm0, 1.0, %v3572_v12  ;;  %3588 = vst [vmem:[#allocation27_spill] sm:$0xff] %v2605_v56  ;;  %3590 = vst [vmem:[#allocation29_spill] sm:$0xff] %v2618_v1  ;;  %v2685_v8 = vmul.f32 %v2340_v5, %v2358_v26  ;;  %v2699_v26 = vsel %vm200_vm9, %v2337_v38, 0.0 }
 0x2e9   :  { %3589 = vst [vmem:[#allocation28_spill] sm:$0xff] %v2615_v7  ;;  %v2621_v27 = vmul.f32 %v1809_v62, %v2265_v28  ;;  %v2626_v56 = vmul.f32 %v1820_v3, %v2442_v17  ;;  %v2639_v39 = vmul.f32 %v2615_v7, %v2272_v37  ;;  %v1529_v62 = vmul.f32 %v2214_v52, %v2246_v20 }
 0x2ea   :  { %v1808_v37 = vsel %vm765_vm7, 1.0, %v3572_v12  ;;  %v583_v3 = vsel %vm200_vm9, %v2618_v1, 0.0  ;;  %v1803_v1 = vsel %vm760_vm8, 1.0, %v3572_v12  ;;  %v913_v58 = vsel %vm200_vm9, %v2658_v40, 0.0 }
 0x2eb   :  { %v2663_v46 = vmul.f32 %v1808_v37, %v2415_v16  ;;  %v1035_v20 = vsel %vm200_vm9, %v2626_v56, 0.0  ;;  %vm997_vm14 = vcmp.eq.f32.partialorder %v2412_v44, %v2407_v54  ;;  %vm1108_vm15 = vcmp.eq.f32.partialorder %v2157_v22, %v2254_v24 }
 0x2ec   :  { %572 = vadd.xlane.f32.xlu0 %v571_v53  ;;  %1259 = vadd.xlane.f32.xlu1 %v1258_v31  ;;  %v1834_v53 = vsel %vm1223_vm3, 1.0, %v3572_v12  ;;  %v1807_v31 = vsel %vm764_vm5, 1.0, %v3572_v12  ;;  %vm879_vm0 = vcmp.eq.f32.partialorder %v2094_v59, %v2235_v15  ;;  %vm1109_vm1 = vcmp.eq.f32.partialorder %v2177_v32, %v2254_v24 }
 0x2ed   :  { %v2633_v61 = vmul.f32 %v1807_v31, %v2415_v16  ;;  %v2650_v13 = vmul.f32 %v1834_v53, %v2471_v50  ;;  %v2675_v53 = vmul.f32 %v2615_v7, %v2319_v18  ;;  %v687_v31 = vsel %vm200_vm9, %v2629_v30, 0.0 }
 0x2ee   :  { %v1543_v18 = vsel %vm200_vm9, %v1529_v62, 0.0  ;;  %v1804_v62 = vsel %vm761_vm11, 1.0, %v3572_v12  ;;  %vm1224_vm2 = vcmp.eq.f32.partialorder %v2157_v22, %v2446_v35  ;;  %vm1110_vm3 = vcmp.eq.f32.partialorder %v2089_v57, %v2254_v24 }
 0x2ef   :  { %3591 = vst [vmem:[#allocation30_spill] sm:$0xff] %v2650_v13  ;;  %3592 = vst [vmem:[#allocation31_spill] sm:$0xff] %v2675_v53  ;;  %v1261_v37 = vsel %vm200_vm9, %v2650_v13, 0.0  ;;  %v2693_v53 = vmul.f32 %v2340_v5, %v2376_v23  ;;  %v1823_v23 = vsel %vm996_vm12, 1.0, %v3572_v12  ;;  %v2716_v13 = vmul.f32 %v2557_v9, %v2420_v34 }
 0x2f0   :  { %798 = vadd.xlane.f32.xlu0 %v797_v0  ;;  %1541 = vadd.xlane.f32.xlu1 %v1540_v21  ;;  %v910_v0 = vsel %vm200_vm9, %v2621_v27, 0.0  ;;  %v1813_v21 = vsel %vm878_vm6, 1.0, %v3572_v12  ;;  %v2730_v34 = vmul.f32 %v2343_v29, %v2455_v49  ;;  %v1827_v22 = vsel %vm1108_vm15, 1.0, %v3572_v12 }
 0x2f1   :  { %3593 = vst [vmem:[#allocation32_spill] sm:$0xff] %v2693_v53  ;;  %v2702_v33 = vmul.f32 %v1813_v21, %v2265_v28  ;;  %3595 = vst [vmem:[#allocation34_spill] sm:$0xff] %v2716_v13  ;;  %v2722_v21 = vmul.f32 %v2615_v7, %v2432_v47  ;;  %v788_v53 = vmul.f32 %v1803_v1, %v2415_v16  ;;  %v1828_v60 = vsel %vm1109_vm1, 1.0, %v3572_v12 }
 0x2f2   :  { %v2735_v13 = vmul.f32 %v1804_v62, %v2415_v16  ;;  %v1818_v16 = vsel %vm991_vm13, 1.0, %v3572_v12  ;;  %vm1225_vm4 = vcmp.eq.f32.partialorder %v2177_v32, %v2446_v35  ;;  %vm880_vm5 = vcmp.eq.f32.partialorder %v2372_v11, %v2235_v15 }
 0x2f3   :  { %3594 = vst [vmem:[#allocation33_spill] sm:$0xff] %v2702_v33  ;;  %v922_v1 = vsel %vm200_vm9, %v2702_v33, 0.0  ;;  %v2773_v62 = vmul.f32 %v2343_v29, %v788_v53  ;;  %vm881_vm6 = vcmp.eq.f32.partialorder %v2412_v44, %v2235_v15  ;;  %v2781_v32 = vmul.f32 %v2340_v5, %v2611_v19 }
 0x2f4   :  { %685 = vadd.xlane.f32.xlu0 %v684_v10  ;;  %584 = vadd.xlane.f32.xlu1 %v583_v3  ;;  %v1817_v10 = vsel %vm990_vm10, 1.0, %v3572_v12  ;;  %v2712_v3 = vmul.f32 %v1823_v23, %v2442_v17  ;;  %v1824_v23 = vsel %vm997_vm14, 1.0, %v3572_v12  ;;  %vm1111_vm7 = vcmp.eq.f32.partialorder %v2094_v59, %v2254_v24 }
 0x2f5   :  { %v2742_v47 = vmul.f32 %v1824_v23, %v2442_v17  ;;  %v2747_v49 = vmul.f32 %v1817_v10, %v2442_v17  ;;  %v1835_v10 = vsel %vm1224_vm2, 1.0, %v3572_v12  ;;  %v2796_v23 = vmul.f32 %v1827_v22, %v2287_v36 }
 0x2f6   :  { %v2799_v19 = vmul.f32 %v1828_v60, %v2287_v36  ;;  %v2802_v33 = vmul.f32 %v1835_v10, %v2471_v50  ;;  %v2812_v22 = vmul.f32 %v2347_v41, %v2658_v40  ;;  %v2816_v60 = vmul.f32 %v2396_v48, %v2529_v14 }
 0x2f7   :  { %v2819_v10 = vmul.f32 %v1818_v16, %v2442_v17  ;;  %v1830_v14 = vsel %vm1111_vm7, 1.0, %v3572_v12  ;;  %vm1226_vm8 = vcmp.eq.f32.partialorder %v2089_v57, %v2446_v35  ;;  %vm1227_vm10 = vcmp.eq.f32.partialorder %v2094_v59, %v2446_v35 }
 0x2f8   :  { %911 = vadd.xlane.f32.xlu0 %v910_v0  ;;  %1036 = vadd.xlane.f32.xlu1 %v1035_v20  ;;  %v2755_v0 = vmul.f32 %v2615_v7, %v2538_v55  ;;  %v2764_v20 = vmul.f32 %v2557_v9, %v2502_v51  ;;  %v2770_v55 = vmul.f32 %v2343_v29, %v2572_v63  ;;  %v1829_v63 = vsel %vm1110_vm3, 1.0, %v3572_v12 }
 0x2f9   :  { %v2785_v51 = vmul.f32 %v2343_v29, %v2735_v13  ;;  %v2806_v7 = vmul.f32 %v2340_v5, %v2629_v30  ;;  %3597 = vst [vmem:[#allocation36_spill] sm:$0xff] %v2816_v60  ;;  %v2833_v40 = vmul.f32 %v1829_v63, %v2287_v36  ;;  %v2851_v16 = vmul.f32 %v2400_v4, %v2796_v23 }
 0x2fa   :  { %v2855_v63 = vmul.f32 %v2396_v48, %v2747_v49  ;;  %vm994_vm11 = vcmp.eq.f32.partialorder %v2089_v57, %v2407_v54  ;;  %vm995_vm13 = vcmp.eq.f32.partialorder %v2094_v59, %v2407_v54  ;;  %vm1112_vm14 = vcmp.eq.f32.partialorder %v2372_v11, %v2254_v24  ;;  %v3624_v54 = vld [vmem:[#allocation9_spill] sm:$0xff] }
 0x2fb   :  { %3596 = vst [vmem:[#allocation35_spill] sm:$0xff] %v2785_v51  ;;  %v1815_v51 = vsel %vm880_vm5, 1.0, %v3572_v12  ;;  %3600 = vst [vmem:[#allocation39_spill] sm:$0xff] %v2851_v16  ;;  %v2872_v16 = vmul.f32 %v2547_v43, %v2802_v33  ;;  %vm1113_vm15 = vcmp.eq.f32.partialorder %v2412_v44, %v2254_v24  ;;  %vm1615_vm5 = vcmask 523264  }
 0x2fc   :  { %688 = vadd.xlane.f32.xlu0 %v687_v31  ;;  %1262 = vadd.xlane.f32.xlu1 %v1261_v37  ;;  %v1836_v31 = vsel %vm1225_vm4, 1.0, %v3572_v12  ;;  %v2793_v37 = vmul.f32 %v2347_v41, %v2621_v27  ;;  %v1816_v27 = vsel %vm881_vm6, 1.0, %v3572_v12  ;;  %3601 = vst [vmem:[#allocation40_spill] sm:$0xff] %v2855_v63  ;;  %v800_v63 = vsel %vm200_vm9, %v788_v53, 0.0 }
 0x2fd   :  { %v2822_v30 = vmul.f32 %v1836_v31, %v2471_v50  ;;  %v2864_v31 = vmul.f32 %v2400_v4, %v2799_v19  ;;  %3604 = vst [vmem:[#allocation43_spill] sm:$0xff] %v2872_v16  ;;  %v1832_v24 = vsel %vm1113_vm15, 1.0, %v3572_v12 }
 0x2ff   :  { %3602 = vst [vmem:[#allocation41_spill] sm:$0xff] %v2864_v31  ;;  %v2880_v15 = vmul.f32 %v2547_v43, %v2822_v30  ;;  %v1430_v31 = vsel %vm200_vm9, %v2351_v42, 0.0 }
 0x300   :  { %914 = vadd.xlane.f32.xlu0 %v913_v58  ;;  %1544 = vadd.xlane.f32.xlu1 %v1543_v18  ;;  %v2826_v18 = vmul.f32 %v2557_v9, %v2337_v38  ;;  %v2830_v58 = vmul.f32 %v2396_v48, %v2626_v56  ;;  %v2844_v38 = vmul.f32 %v1815_v51, %v2265_v28  ;;  %v1814_v51 = vsel %vm879_vm0, 1.0, %v3572_v12 }
 0x301   :  { %v2847_v56 = vmul.f32 %v1816_v27, %v2265_v28  ;;  %v2868_v27 = vmul.f32 %v2557_v9, %v2392_v45  ;;  %3605 = vst [vmem:[#allocation44_spill] sm:$0xff] %v2880_v15  ;;  %v907_v16 = vmul.f32 %v1814_v51, %v2265_v28  ;;  %v3608_v15 = vld [vmem:[#allocation12_spill] sm:$0xff]  ;;  %v3612_v51 = vld [vmem:[#allocation3_spill] sm:$0xff] }
 0x302   :  { %3598 = vst [vmem:[#allocation37_spill] sm:$0xff] %v2826_v18  ;;  %3599 = vst [vmem:[#allocation38_spill] sm:$0xff] %v2830_v58  ;;  %v2898_v53 = vmul.f32 %v2347_v41, %v2844_v38  ;;  %v2902_v42 = vmul.f32 %v2340_v5, %v3608_v15  ;;  %vm1458_vm12 = vcmp.eq.f32.partialorder %v2089_v57, %v3612_v51  ;;  %v3625_v58 = vld [vmem:[#allocation4_spill] sm:$0xff] }
 0x303   :  { %3603 = vst [vmem:[#allocation42_spill] sm:$0xff] %v2868_v27  ;;  %v1838_v27 = vsel %vm1227_vm10, 1.0, %v3572_v12  ;;  %v2913_v28 = vmul.f32 %v2347_v41, %v2847_v56  ;;  %v2934_v57 = vmul.f32 %v2396_v48, %v2712_v3  ;;  %vm1459_vm0 = vcmp.eq.f32.partialorder %v2094_v59, %v3612_v51  ;;  %v3628_v59 = vld [vmem:[#allocation24_spill] sm:$0xff] }
 0x304   :  { %459 = vadd.xlane.f32.xlu0 %v2699_v26  ;;  %923 = vadd.xlane.f32.xlu1 %v922_v1  ;;  %v2875_v26 = vmul.f32 %v1830_v14, %v2287_v36  ;;  %v1837_v1 = vsel %vm1226_vm8, 1.0, %v3572_v12  ;;  %v2891_v14 = vmul.f32 %v2396_v48, %v2819_v10  ;;  %3607 = vst [vmem:[#allocation46_spill] sm:$0xff] %v2898_v53  ;;  %3609 = vst [vmem:[#allocation12_spill] sm:$0xff] %v2902_v42  ;;  %v3613_v42 = vld [vmem:[#allocation15_spill] sm:$0xff] }
 0x305   :  { %v2905_v35 = vmul.f32 %v1837_v1, %v2471_v50  ;;  %3611 = vst [vmem:[#allocation48_spill] sm:$0xff] %v2913_v28  ;;  %v2918_v53 = vmul.f32 %v1838_v27, %v2471_v50  ;;  %v1026_v1 = vsel %vm200_vm9, %v2747_v49, 0.0  ;;  %v1821_v28 = vsel %vm994_vm11, 1.0, %v3572_v12  ;;  %3616 = vst [vmem:[#allocation49_spill] sm:$0xff] %v2934_v57  ;;  %v3617_v27 = vld [vmem:[#allocation17_spill] sm:$0xff]  ;;  %v3621_v57 = vld [vmem:[#allocation18_spill] sm:$0xff] }
 0x306   :  { %3606 = vst [vmem:[#allocation45_spill] sm:$0xff] %v2891_v14  ;;  %v2909_v14 = vmul.f32 %v2400_v4, %v2833_v40  ;;  %v2938_v50 = vmul.f32 %v2557_v9, %v3617_v27  ;;  %v2947_v49 = vmul.f32 %v2396_v48, %v2742_v47  ;;  %vm1460_vm1 = vcmp.eq.f32.partialorder %v2372_v11, %v3612_v51 }
 0x307   :  { %vm1461_vm2 = vcmp.eq.f32.partialorder %v2412_v44, %v3612_v51  ;;  %v1148_v51 = vsel %vm200_vm9, %v2796_v23, 0.0 }
 0x308   :  { %801 = vadd.xlane.f32.xlu0 %v800_v63  ;;  %1431 = vadd.xlane.f32.xlu1 %v1430_v31  ;;  %3610 = vst [vmem:[#allocation47_spill] sm:$0xff] %v2909_v14  ;;  %v2922_v63 = vmul.f32 %v2340_v5, %v3613_v42  ;;  %v2926_v31 = vmul.f32 %v2400_v4, %v2875_v26  ;;  %v925_v14 = vsel %vm200_vm9, %v907_v16, 0.0  ;;  %3618 = vst [vmem:[#allocation17_spill] sm:$0xff] %v2938_v50 }
 0x309   :  { %3620 = vst [vmem:[#allocation51_spill] sm:$0xff] %v2947_v49  ;;  %v461_v49 = vsel %vm200_vm9, %v2392_v45, 0.0  ;;  %v1433_v50 = vsel %vm200_vm9, %v3624_v54, 0.0  ;;  %v803_v45 = vsel %vm200_vm9, %v2735_v13, 0.0  ;;  %v1854_v13 = vsel %vm1459_vm0, 1.0, %v3572_v12 }
 0x30a   :  { %3614 = vst [vmem:[#allocation3_spill] sm:$0xff] %v2922_v63  ;;  %3615 = vst [vmem:[#allocation15_spill] sm:$0xff] %v2926_v31  ;;  %v1853_v63 = vsel %vm1458_vm12, 1.0, %v3572_v12  ;;  %v2943_v31 = vmul.f32 %v2547_v43, %v2905_v35 }
 0x30b   :  { %v2969_v18 = vmul.f32 %v1853_v63, %v3625_v58 }
 0x30c   :  { %1027 = vadd.xlane.f32.xlu0 %v1026_v1  ;;  %926 = vadd.xlane.f32.xlu1 %v925_v14  ;;  %3619 = vst [vmem:[#allocation50_spill] sm:$0xff] %v2943_v31  ;;  %v2955_v1 = vmul.f32 %v2343_v29, %v3621_v57  ;;  %v2959_v14 = vmul.f32 %v2547_v43, %v2918_v53 }
 0x30d   :  { %v1022_v31 = vmul.f32 %v1821_v28, %v2442_v17  ;;  %v1822_v28 = vsel %vm995_vm13, 1.0, %v3572_v12  ;;  %v2999_v43 = vmul.f32 %v1832_v24, %v2287_v36  ;;  %v3023_v24 = vmul.f32 %v1854_v13, %v3625_v58 }
 0x30e   :  { %3622 = vst [vmem:[#allocation18_spill] sm:$0xff] %v2955_v1  ;;  %3623 = vst [vmem:[#allocation52_spill] sm:$0xff] %v2959_v14  ;;  %v2973_v1 = vmul.f32 %v2557_v9, %v2513_v6  ;;  %v1831_v14 = vsel %vm1112_vm14, 1.0, %v3572_v12  ;;  %v2985_v9 = vmul.f32 %v2343_v29, %v2532_v25 }
 0x30f   :  { %v1038_v63 = vsel %vm200_vm9, %v1022_v31, 0.0  ;;  %v2991_v54 = vmul.f32 %v1831_v14, %v2287_v36  ;;  %v3010_v14 = vmul.f32 %v2343_v29, %v2633_v61  ;;  %v3019_v36 = vmul.f32 %v2343_v29, %v2663_v46 }
 0x310   :  { %3626 = vst [vmem:[#allocation9_spill] sm:$0xff] %v2973_v1  ;;  %462 = vadd.xlane.f32.xlu0 %v461_v49  ;;  %1434 = vadd.xlane.f32.xlu1 %v1433_v50  ;;  %3627 = vst [vmem:[#allocation4_spill] sm:$0xff] %v2985_v9  ;;  %v1530_v50 = vmul.f32 %v2214_v52, %v2969_v18  ;;  %v1023_v49 = vmul.f32 %v1822_v28, %v2442_v17  ;;  %v3629_v9 = vld [vmem:[#allocation26_spill] sm:$0xff]  ;;  %v1029_v28 = vsel %vm200_vm9, %v2819_v10, 0.0 }
 0x311   :  { %v2995_v1 = vmul.f32 %v2340_v5, %v3628_v59  ;;  %v3003_v60 = vmul.f32 %v2340_v5, %v3629_v9  ;;  %v3006_v17 = vmul.f32 %v2347_v41, %v907_v16  ;;  %v3034_v10 = vmul.f32 %v2400_v4, %v2999_v43 }
 0x312   :  { %v1546_v5 = vsel %vm200_vm9, %v1530_v50, 0.0  ;;  %v3026_v16 = vmul.f32 %v2396_v48, %v1023_v49  ;;  %v690_v29 = vsel %vm200_vm9, %v3608_v15, 0.0  ;;  %v1531_v50 = vmul.f32 %v2214_v52, %v3023_v24 }
 0x313   :  { %v1154_v15 = vsel %vm200_vm9, %v2833_v40, 0.0  ;;  %v1855_v40 = vsel %vm1460_vm1, 1.0, %v3572_v12 }
 0x314   :  { %804 = vadd.xlane.f32.xlu0 %v803_v45  ;;  %1039 = vadd.xlane.f32.xlu1 %v1038_v63  ;;  %v3015_v45 = vmul.f32 %v2396_v48, %v1022_v31  ;;  %v3030_v63 = vmul.f32 %v2400_v4, %v2991_v54  ;;  %v1041_v31 = vsel %vm200_vm9, %v1023_v49, 0.0  ;;  %v693_v48 = vsel %vm200_vm9, %v3613_v42, 0.0 }
 0x315   :  { %v1549_v13 = vsel %vm200_vm9, %v1531_v50, 0.0  ;;  %v806_v49 = vsel %vm200_vm9, %v3621_v57, 0.0  ;;  %v467_v42 = vsel %vm200_vm9, %v2513_v6, 0.0  ;;  %v809_v57 = vsel %vm200_vm9, %v2532_v25, 0.0 }
 0x316   :  { %v1270_v25 = vsel %vm200_vm9, %v2905_v35, 0.0 }
 0x318   :  { %1030 = vadd.xlane.f32.xlu0 %v1029_v28  ;;  %1547 = vadd.xlane.f32.xlu1 %v1546_v5  ;;  %v464_v28 = vsel %vm200_vm9, %v3617_v27, 0.0  ;;  %v3630_v5 = vld [vmem:[#allocation20_spill] sm:$0xff]  ;;  %v1157_v27 = vsel %vm200_vm9, %v2875_v26, 0.0  ;;  %v696_v26 = vsel %vm200_vm9, %v3628_v59, 0.0 }
 0x31c   :  { %691 = vadd.xlane.f32.xlu0 %v690_v29  ;;  %1042 = vadd.xlane.f32.xlu1 %v1041_v31  ;;  %v1436_v29 = vsel %vm200_vm9, %v3630_v5, 0.0  ;;  %v3631_v31 = vld [vmem:[#allocation25_spill] sm:$0xff] }
 0x31d   :  { %v1439_v50 = vsel %vm200_vm9, %v3631_v31, 0.0  ;;  %v1151_v31 = vsel %vm200_vm9, %v2799_v19, 0.0  ;;  %v1264_v19 = vsel %vm200_vm9, %v2802_v33, 0.0 }
 0x320   :  { %694 = vadd.xlane.f32.xlu0 %v693_v48  ;;  %1550 = vadd.xlane.f32.xlu1 %v1549_v13  ;;  %v3064_v48 = vmul.f32 %v1855_v40, %v3625_v58  ;;  %v1273_v40 = vsel %vm200_vm9, %v2918_v53, 0.0  ;;  %v3636_v53 = vld [vmem:[#allocation27_spill] sm:$0xff] }
 0x324   :  { %465 = vadd.xlane.f32.xlu0 %v464_v28  ;;  %1155 = vadd.xlane.f32.xlu1 %v1154_v15  ;;  %v1532_v28 = vmul.f32 %v2214_v52, %v3064_v48  ;;  %v1856_v15 = vsel %vm1461_vm2, 1.0, %v3572_v12 }
 0x325   :  { %v3087_v59 = vmul.f32 %v1856_v15, %v3625_v58 }
 0x328   :  { %807 = vadd.xlane.f32.xlu0 %v806_v49  ;;  %1437 = vadd.xlane.f32.xlu1 %v1436_v29  ;;  %v1552_v29 = vsel %vm200_vm9, %v1532_v28, 0.0 }
 0x32c   :  { %468 = vadd.xlane.f32.xlu0 %v467_v42  ;;  %1158 = vadd.xlane.f32.xlu1 %v1157_v27  ;;  %v699_v27 = vsel %vm200_vm9, %v3629_v9, 0.0 }
 0x330   :  { %810 = vadd.xlane.f32.xlu0 %v809_v57  ;;  %1440 = vadd.xlane.f32.xlu1 %v1439_v50  ;;  %v1533_v57 = vmul.f32 %v2214_v52, %v3087_v59  ;;  %v812_v52 = vsel %vm200_vm9, %v2633_v61, 0.0 }
 0x331   :  { %v3066_v13 = vpop.xlane.xlu1 %1387  ;;  %v3068_v6 = vpop.xlane.xlu0 %1375 }
 0x332   :  { %3632 = vst [vmem:[#allocation24_spill] sm:$0xff] %v3066_v13  ;;  %v1555_v50 = vsel %vm200_vm9, %v1533_v57, 0.0  ;;  %v3652_v13 = vld [vmem:[#allocation6_spill] sm:$0xff] }
 0x334   :  { %697 = vadd.xlane.f32.xlu0 %v696_v26  ;;  %1271 = vadd.xlane.f32.xlu1 %v1270_v25  ;;  %v490_v25 = vsel %vm200_vm9, %v3636_v53, 0.0 }
 0x335   :  { %v3079_v49 = vpop.xlane.xlu1 %1390  ;;  %v3081_v5 = vpop.xlane.xlu0 %1378 }
 0x336   :  { %3633 = vst [vmem:[#allocation26_spill] sm:$0xff] %v3079_v49  ;;  %3634 = vst [vmem:[#allocation20_spill] sm:$0xff] %v3081_v5  ;;  %v3650_v49 = vld [vmem:[#allocation41_spill] sm:$0xff] }
 0x338   :  { %1149 = vadd.xlane.f32.xlu0 %v1148_v51  ;;  %1553 = vadd.xlane.f32.xlu1 %v1552_v29  ;;  %v606_v51 = vsel %vm200_vm9, %v2639_v39, 0.0  ;;  %v1267_v39 = vsel %vm200_vm9, %v2822_v30, 0.0 }
 0x339   :  { %v448_v35 = vpop.xlane.xlu1 %447  ;;  %v3089_v42 = vpop.xlane.xlu0 %1491 }
 0x33c   :  { %700 = vadd.xlane.f32.xlu0 %v699_v27  ;;  %1274 = vadd.xlane.f32.xlu1 %v1273_v40  ;;  %v815_v27 = vsel %vm200_vm9, %v2663_v46, 0.0  ;;  %v493_v40 = vsel %vm200_vm9, %v2645_v2, 0.0  ;;  %v928_v2 = vsel %vm200_vm9, %v2844_v38, 0.0 }
 0x33d   :  { %v3097_v23 = vpop.xlane.xlu1 %1419  ;;  %v3099_v58 = vpop.xlane.xlu0 %1494 }
 0x33e   :  { %3635 = vst [vmem:[#allocation25_spill] sm:$0xff] %v3099_v58 }
 0x340   :  { %1152 = vadd.xlane.f32.xlu0 %v1151_v31  ;;  %1556 = vadd.xlane.f32.xlu1 %v1555_v50  ;;  %v3637_v31 = vld [vmem:[#allocation31_spill] sm:$0xff] }
 0x341   :  { %v3104_v9 = vpop.xlane.xlu1 %1422  ;;  %v3106_v26 = vpop.xlane.xlu0 %1381  ;;  %v609_v50 = vsel %vm200_vm9, %v3637_v31, 0.0  ;;  %v3639_v31 = vld [vmem:[#allocation34_spill] sm:$0xff] }
 0x344   :  { %813 = vadd.xlane.f32.xlu0 %v812_v52  ;;  %491 = vadd.xlane.f32.xlu1 %v490_v25  ;;  %v722_v25 = vsel %vm200_vm9, %v2685_v8, 0.0  ;;  %v1044_v8 = vsel %vm200_vm9, %v2712_v3, 0.0 }
 0x345   :  { %v3112_v28 = vpop.xlane.xlu1 %575  ;;  %v3114_v15 = vpop.xlane.xlu0 %1384 }
 0x348   :  { %1265 = vadd.xlane.f32.xlu0 %v1264_v19  ;;  %607 = vadd.xlane.f32.xlu1 %v606_v51  ;;  %v931_v51 = vsel %vm200_vm9, %v2847_v56, 0.0 }
 0x349   :  { %v3120_v29 = vpop.xlane.xlu1 %1535  ;;  %v3122_v61 = vpop.xlane.xlu0 %1497 }
 0x34c   :  { %816 = vadd.xlane.f32.xlu0 %v815_v27  ;;  %494 = vadd.xlane.f32.xlu1 %v493_v40  ;;  %v3638_v27 = vld [vmem:[#allocation32_spill] sm:$0xff] }
 0x34d   :  { %v3128_v57 = vpop.xlane.xlu1 %578  ;;  %v3130_v33 = vpop.xlane.xlu0 %1500  ;;  %v725_v40 = vsel %vm200_vm9, %v3638_v27, 0.0 }
 0x350   :  { %1268 = vadd.xlane.f32.xlu0 %v1267_v39  ;;  %610 = vadd.xlane.f32.xlu1 %v609_v50  ;;  %v496_v50 = vsel %vm200_vm9, %v3639_v31, 0.0 }
 0x351   :  { %v3136_v52 = vpop.xlane.xlu1 %1538  ;;  %v564_v46 = vpop.xlane.xlu0 %563 }
 0x352   :  { %v586_v53 = vadd.f32 %v564_v46, %v448_v35 }
 0x354   :  { %929 = vadd.xlane.f32.xlu0 %v928_v2  ;;  %723 = vadd.xlane.f32.xlu1 %v722_v25  ;;  %v1047_v25 = vsel %vm200_vm9, %v2742_v47, 0.0 }
 0x355   :  { %v3142_v19 = vpop.xlane.xlu1 %917  ;;  %v451_v30 = vpop.xlane.xlu0 %450 }
 0x358   :  { %932 = vadd.xlane.f32.xlu0 %v931_v51  ;;  %726 = vadd.xlane.f32.xlu1 %v725_v40  ;;  %v612_v51 = vsel %vm200_vm9, %v2722_v21, 0.0  ;;  %v1160_v40 = vsel %vm200_vm9, %v2991_v54, 0.0  ;;  %v1163_v21 = vsel %vm200_vm9, %v2999_v43, 0.0 }
 0x359   :  { %v3148_v35 = vpop.xlane.xlu1 %1143  ;;  %v567_v39 = vpop.xlane.xlu0 %566 }
 0x35a   :  { %v587_v38 = vadd.f32 %v567_v39, %v451_v30  ;;  %v838_v39 = vsel %vm200_vm9, %v2730_v34, 0.0  ;;  %v499_v34 = vsel %vm200_vm9, %v2764_v20, 0.0 }
 0x35c   :  { %1045 = vadd.xlane.f32.xlu0 %v1044_v8  ;;  %497 = vadd.xlane.f32.xlu1 %v496_v50  ;;  %v615_v8 = vsel %vm200_vm9, %v2755_v0, 0.0  ;;  %v841_v50 = vsel %vm200_vm9, %v2770_v55, 0.0  ;;  %v844_v0 = vsel %vm200_vm9, %v2773_v62, 0.0 }
 0x35d   :  { %v3154_v46 = vpop.xlane.xlu1 %1425  ;;  %v680_v56 = vpop.xlane.xlu0 %679 }
 0x35e   :  { %v702_v2 = vadd.f32 %v680_v56, %v586_v53 }
 0x360   :  { %1048 = vadd.xlane.f32.xlu0 %v1047_v25  ;;  %613 = vadd.xlane.f32.xlu1 %v612_v51  ;;  %v728_v51 = vsel %vm200_vm9, %v2781_v32, 0.0 }
 0x361   :  { %v3160_v30 = vpop.xlane.xlu1 %920  ;;  %v683_v3 = vpop.xlane.xlu0 %682 }
 0x362   :  { %v703_v27 = vadd.f32 %v683_v3, %v587_v38 }
 0x364   :  { %1161 = vadd.xlane.f32.xlu0 %v1160_v40  ;;  %839 = vadd.xlane.f32.xlu1 %v838_v39  ;;  %v3640_v40 = vld [vmem:[#allocation35_spill] sm:$0xff]  ;;  %v954_v39 = vsel %vm200_vm9, %v2793_v37, 0.0 }
 0x365   :  { %v3166_v53 = vpop.xlane.xlu1 %1146  ;;  %v454_v47 = vpop.xlane.xlu0 %453  ;;  %v847_v55 = vsel %vm200_vm9, %v3640_v40, 0.0  ;;  %v957_v40 = vsel %vm200_vm9, %v2812_v22, 0.0 }
 0x368   :  { %1164 = vadd.xlane.f32.xlu0 %v1163_v21  ;;  %616 = vadd.xlane.f32.xlu1 %v615_v8 }
 0x369   :  { %v3172_v38 = vpop.xlane.xlu1 %1428  ;;  %v570_v31 = vpop.xlane.xlu0 %569 }
 0x36a   :  { %v588_v54 = vadd.f32 %v570_v31, %v454_v47  ;;  %v3641_v47 = vld [vmem:[#allocation7_spill] sm:$0xff]  ;;  %v731_v31 = vsel %vm200_vm9, %v2806_v7, 0.0 }
 0x36c   :  { %500 = vadd.xlane.f32.xlu0 %v499_v34  ;;  %842 = vadd.xlane.f32.xlu1 %v841_v50  ;;  %v3642_v34 = vld [vmem:[#allocation10_spill] sm:$0xff] }
 0x36d   :  { %v3178_v56 = vpop.xlane.xlu1 %581  ;;  %v796_v43 = vpop.xlane.xlu0 %795  ;;  %v949_v50 = vmul.f32 %v2347_v41, %v3642_v34 }
 0x36e   :  { %v818_v25 = vadd.f32 %v796_v43, %v702_v2  ;;  %v948_v2 = vmul.f32 %v2347_v41, %v3641_v47 }
 0x370   :  { %845 = vadd.xlane.f32.xlu0 %v844_v0  ;;  %729 = vadd.xlane.f32.xlu1 %v728_v51  ;;  %v960_v8 = vsel %vm200_vm9, %v948_v2, 0.0  ;;  %v963_v51 = vsel %vm200_vm9, %v949_v50, 0.0  ;;  %v3644_v2 = vld [vmem:[#allocation37_spill] sm:$0xff] }
 0x371   :  { %v3184_v3 = vpop.xlane.xlu1 %1033  ;;  %v457_v20 = vpop.xlane.xlu0 %456 }
 0x374   :  { %848 = vadd.xlane.f32.xlu0 %v847_v55  ;;  %955 = vadd.xlane.f32.xlu1 %v954_v39  ;;  %v3643_v39 = vld [vmem:[#allocation36_spill] sm:$0xff] }
 0x375   :  { %v3192_v62 = vpop.xlane.xlu1 %1259  ;;  %v573_v21 = vpop.xlane.xlu0 %572  ;;  %v1076_v47 = vsel %vm200_vm9, %v3643_v39, 0.0 }
 0x376   :  { %v589_v32 = vadd.f32 %v573_v21, %v457_v20  ;;  %v502_v21 = vsel %vm200_vm9, %v3644_v2, 0.0  ;;  %v3648_v2 = vld [vmem:[#allocation39_spill] sm:$0xff] }
 0x378   :  { %961 = vadd.xlane.f32.xlu0 %v960_v8  ;;  %732 = vadd.xlane.f32.xlu1 %v731_v31  ;;  %v3645_v8 = vld [vmem:[#allocation5_spill] sm:$0xff]  ;;  %v3646_v31 = vld [vmem:[#allocation28_spill] sm:$0xff] }
 0x379   :  { %v3199_v37 = vpop.xlane.xlu1 %1541  ;;  %v799_v43 = vpop.xlane.xlu0 %798 }
 0x37a   :  { %v819_v0 = vadd.f32 %v799_v43, %v703_v27  ;;  %v602_v27 = vmul.f32 %v3646_v31, %v3645_v8  ;;  %v3647_v43 = vld [vmem:[#allocation38_spill] sm:$0xff]  ;;  %v1192_v8 = vsel %vm200_vm9, %v3648_v2, 0.0 }
 0x37c   :  { %964 = vadd.xlane.f32.xlu0 %v963_v51  ;;  %958 = vadd.xlane.f32.xlu1 %v957_v40  ;;  %v1079_v51 = vsel %vm200_vm9, %v3647_v43, 0.0 }
 0x37d   :  { %v3204_v20 = vpop.xlane.xlu1 %584  ;;  %v686_v55 = vpop.xlane.xlu0 %685 }
 0x37e   :  { %v704_v7 = vadd.f32 %v686_v55, %v588_v54  ;;  %v618_v54 = vsel %vm200_vm9, %v602_v27, 0.0  ;;  %v1195_v27 = vsel %vm200_vm9, %v3650_v49, 0.0 }
 0x380   :  { %1077 = vadd.xlane.f32.xlu0 %v1076_v47  ;;  %503 = vadd.xlane.f32.xlu1 %v502_v21  ;;  %v3649_v47 = vld [vmem:[#allocation40_spill] sm:$0xff] }
 0x381   :  { %v3212_v34 = vpop.xlane.xlu1 %1036  ;;  %v912_v22 = vpop.xlane.xlu0 %911  ;;  %v1070_v21 = vsel %vm200_vm9, %v3649_v47, 0.0 }
 0x382   :  { %v934_v50 = vadd.f32 %v912_v22, %v818_v25 }
 0x384   :  { %1080 = vadd.xlane.f32.xlu0 %v1079_v51  ;;  %619 = vadd.xlane.f32.xlu1 %v618_v54  ;;  %v3651_v51 = vld [vmem:[#allocation42_spill] sm:$0xff] }
 0x385   :  { %v3217_v40 = vpop.xlane.xlu1 %1262  ;;  %v689_v55 = vpop.xlane.xlu0 %688  ;;  %v505_v54 = vsel %vm200_vm9, %v3651_v51, 0.0  ;;  %v3655_v51 = vld [vmem:[#allocation44_spill] sm:$0xff] }
 0x386   :  { %v705_v39 = vadd.f32 %v689_v55, %v589_v32  ;;  %v603_v32 = vmul.f32 %v3646_v31, %v3652_v13  ;;  %v1311_v58 = vsel %vm200_vm9, %v3655_v51, 0.0  ;;  %v3656_v13 = vld [vmem:[#allocation45_spill] sm:$0xff] }
 0x388   :  { %1193 = vadd.xlane.f32.xlu0 %v1192_v8  ;;  %1071 = vadd.xlane.f32.xlu1 %v1070_v21  ;;  %v3653_v8 = vld [vmem:[#allocation43_spill] sm:$0xff]  ;;  %v621_v21 = vsel %vm200_vm9, %v603_v32, 0.0 }
 0x389   :  { %v3223_v25 = vpop.xlane.xlu1 %1544  ;;  %v915_v22 = vpop.xlane.xlu0 %914  ;;  %v1308_v47 = vsel %vm200_vm9, %v3653_v8, 0.0 }
 0x38a   :  { %v935_v43 = vadd.f32 %v915_v22, %v819_v0 }
 0x38c   :  { %1196 = vadd.xlane.f32.xlu0 %v1195_v27  ;;  %506 = vadd.xlane.f32.xlu1 %v505_v54  ;;  %v1073_v27 = vsel %vm200_vm9, %v3656_v13, 0.0 }
 0x38d   :  { %v3231_v55 = vpop.xlane.xlu1 %923  ;;  %v460_v2 = vpop.xlane.xlu0 %459 }
 0x390   :  { %1309 = vadd.xlane.f32.xlu0 %v1308_v47  ;;  %622 = vadd.xlane.f32.xlu1 %v621_v21  ;;  %v3657_v21 = vld [vmem:[#allocation46_spill] sm:$0xff] }
 0x391   :  { %v3236_v0 = vpop.xlane.xlu1 %1431  ;;  %v802_v49 = vpop.xlane.xlu0 %801 }
 0x392   :  { %3654 = vst [vmem:[#allocation27_spill] sm:$0xff] %v3236_v0  ;;  %v820_v22 = vadd.f32 %v802_v49, %v704_v7  ;;  %v972_v7 = vsel %vm200_vm9, %v3657_v21, 0.0  ;;  %v3658_v49 = vld [vmem:[#allocation12_spill] sm:$0xff] }
 0x393   :  { %v734_v51 = vsel %vm200_vm9, %v3658_v49, 0.0  ;;  %v3659_v0 = vld [vmem:[#allocation8_spill] sm:$0xff] }
 0x394   :  { %v936_v54 = vadd.f32 %v3142_v19, %v820_v22  ;;  %1312 = vadd.xlane.f32.xlu0 %v1311_v58  ;;  %1074 = vadd.xlane.f32.xlu1 %v1073_v27  ;;  %v1178_v13 = vmul.f32 %v2400_v4, %v3659_v0  ;;  %v3661_v49 = vld [vmem:[#allocation48_spill] sm:$0xff] }
 0x395   :  { %v3243_v5 = vpop.xlane.xlu1 %926  ;;  %v1028_v8 = vpop.xlane.xlu0 %1027 }
 0x396   :  { %v1050_v32 = vadd.f32 %v1028_v8, %v934_v50  ;;  %v3246_v47 = vadd.f32 %v3184_v3, %v936_v54  ;;  %v3660_v3 = vld [vmem:[#allocation47_spill] sm:$0xff]  ;;  %v1186_v54 = vsel %vm200_vm9, %v1178_v13, 0.0 }
 0x397   :  { %v1198_v27 = vsel %vm200_vm9, %v3660_v3, 0.0 }
 0x398   :  { %v1166_v19 = vadd.f32 %v3148_v35, %v1050_v32  ;;  %973 = vadd.xlane.f32.xlu0 %v972_v7  ;;  %735 = vadd.xlane.f32.xlu1 %v734_v51  ;;  %v975_v35 = vsel %vm200_vm9, %v3661_v49, 0.0  ;;  %v3662_v32 = vld [vmem:[#allocation3_spill] sm:$0xff] }
 0x399   :  { %v3255_v58 = vpop.xlane.xlu1 %1434  ;;  %v463_v22 = vpop.xlane.xlu0 %462  ;;  %v737_v7 = vsel %vm200_vm9, %v3662_v32, 0.0  ;;  %v3663_v51 = vld [vmem:[#allocation11_spill] sm:$0xff]  ;;  %v590_v32 = vadd.f32 %v3112_v28, %v460_v2 }
 0x39a   :  { %v3258_v50 = vadd.f32 %v3192_v62, %v1166_v19  ;;  %v1179_v62 = vmul.f32 %v2400_v4, %v3663_v51  ;;  %v3666_v51 = vld [vmem:[#allocation17_spill] sm:$0xff]  ;;  %v591_v28 = vadd.f32 %v3128_v57, %v463_v22  ;;  %v3670_v22 = vld [vmem:[#allocation51_spill] sm:$0xff] }
 0x39c   :  { %1199 = vadd.xlane.f32.xlu0 %v1198_v27  ;;  %1187 = vadd.xlane.f32.xlu1 %v1186_v54  ;;  %v1189_v49 = vsel %vm200_vm9, %v1179_v62, 0.0 }
 0x39d   :  { %v1040_v8 = vpop.xlane.xlu1 %1039  ;;  %v805_v21 = vpop.xlane.xlu0 %804 }
 0x39e   :  { %v821_v0 = vadd.f32 %v805_v21, %v705_v39  ;;  %v3664_v39 = vld [vmem:[#allocation15_spill] sm:$0xff] }
 0x39f   :  { %v1201_v21 = vsel %vm200_vm9, %v3664_v39, 0.0 }
 0x3a0   :  { %v937_v19 = vadd.f32 %v3160_v30, %v821_v0  ;;  %976 = vadd.xlane.f32.xlu0 %v975_v35  ;;  %738 = vadd.xlane.f32.xlu1 %v737_v7  ;;  %v3665_v7 = vld [vmem:[#allocation49_spill] sm:$0xff] }
 0x3a1   :  { %v3270_v3 = vpop.xlane.xlu1 %1547  ;;  %v1031_v13 = vpop.xlane.xlu0 %1030 }
 0x3a2   :  { %v1051_v27 = vadd.f32 %v1031_v13, %v935_v43  ;;  %v3273_v54 = vadd.f32 %v3212_v34, %v937_v19  ;;  %v1088_v34 = vsel %vm200_vm9, %v3665_v7, 0.0  ;;  %v508_v19 = vsel %vm200_vm9, %v3666_v51, 0.0  ;;  %v3667_v13 = vld [vmem:[#allocation14_spill] sm:$0xff]  ;;  %v3672_v51 = vld [vmem:[#allocation23_spill] sm:$0xff] }
 0x3a3   :  { %v604_v62 = vmul.f32 %v3646_v31, %v3667_v13  ;;  %v3671_v7 = vld [vmem:[#allocation18_spill] sm:$0xff] }
 0x3a4   :  { %v1167_v4 = vadd.f32 %v3166_v53, %v1051_v27  ;;  %1202 = vadd.xlane.f32.xlu0 %v1201_v21  ;;  %1190 = vadd.xlane.f32.xlu1 %v1189_v49 }
 0x3a5   :  { %v1043_v30 = vpop.xlane.xlu1 %1042  ;;  %v692_v0 = vpop.xlane.xlu0 %691  ;;  %v624_v21 = vsel %vm200_vm9, %v604_v62, 0.0 }
 0x3a6   :  { %v3281_v35 = vadd.f32 %v3217_v40, %v1167_v4  ;;  %v706_v43 = vadd.f32 %v692_v0, %v590_v32  ;;  %v3668_v40 = vld [vmem:[#allocation50_spill] sm:$0xff]  ;;  %v3669_v4 = vld [vmem:[#allocation13_spill] sm:$0xff]  ;;  %v1091_v0 = vsel %vm200_vm9, %v3670_v22, 0.0 }
 0x3a7   :  { %v1314_v39 = vsel %vm200_vm9, %v3668_v40, 0.0  ;;  %vm1228_vm3 = vcmp.eq.f32.partialorder %v2372_v11, %v3669_v4  ;;  %vm1229_vm4 = vcmp.eq.f32.partialorder %v2412_v44, %v3669_v4  ;;  %v3676_v4 = vld [vmem:[#allocation9_spill] sm:$0xff] }
 0x3a8   :  { %1089 = vadd.xlane.f32.xlu0 %v1088_v34  ;;  %509 = vadd.xlane.f32.xlu1 %v508_v19  ;;  %v850_v34 = vsel %vm200_vm9, %v3671_v7, 0.0  ;;  %v3673_v19 = vld [vmem:[#allocation22_spill] sm:$0xff]  ;;  %v1839_v62 = vsel %vm1228_vm3, 1.0, %v3572_v12 }
 0x3a9   :  { %v3290_v53 = vpop.xlane.xlu1 %1550  ;;  %v695_v2 = vpop.xlane.xlu0 %694  ;;  %v1294_v13 = vmul.f32 %v3673_v19, %v3672_v51 }
 0x3aa   :  { %v707_v27 = vadd.f32 %v695_v2, %v591_v28 }
 0x3ac   :  { %1315 = vadd.xlane.f32.xlu0 %v1314_v39  ;;  %625 = vadd.xlane.f32.xlu1 %v624_v21  ;;  %v1302_v39 = vsel %vm200_vm9, %v1294_v13, 0.0  ;;  %v3675_v21 = vld [vmem:[#allocation16_spill] sm:$0xff]  ;;  %v511_v13 = vsel %vm200_vm9, %v3676_v4, 0.0  ;;  %v3680_v4 = vld [vmem:[#allocation30_spill] sm:$0xff] }
 0x3ad   :  { %v1156_v49 = vpop.xlane.xlu1 %1155  ;;  %v466_v32 = vpop.xlane.xlu0 %465 }
 0x3ae   :  { %v592_v57 = vadd.f32 %v3178_v56, %v466_v32  ;;  %v3674_v56 = vld [vmem:[#allocation52_spill] sm:$0xff]  ;;  %v3313_v32 = vmul.f32 %v1839_v62, %v3675_v21 }
 0x3af   :  { %v1317_v40 = vsel %vm200_vm9, %v3674_v56, 0.0 }
 0x3b0   :  { %1092 = vadd.xlane.f32.xlu0 %v1091_v0  ;;  %851 = vadd.xlane.f32.xlu1 %v850_v34  ;;  %v1840_v0 = vsel %vm1229_vm4, 1.0, %v3572_v12 }
 0x3b1   :  { %v3305_v28 = vpop.xlane.xlu1 %1437  ;;  %v808_v2 = vpop.xlane.xlu0 %807  ;;  %v3323_v62 = vmul.f32 %v1840_v0, %v3675_v21 }
 0x3b2   :  { %v822_v11 = vadd.f32 %v808_v2, %v706_v43  ;;  %v1276_v43 = vsel %vm200_vm9, %v3313_v32, 0.0  ;;  %v3677_v2 = vld [vmem:[#allocation29_spill] sm:$0xff] }
 0x3b4   :  { %v938_v22 = vadd.f32 %v3231_v55, %v822_v11  ;;  %1318 = vadd.xlane.f32.xlu0 %v1317_v40  ;;  %1303 = vadd.xlane.f32.xlu1 %v1302_v39  ;;  %v605_v55 = vmul.f32 %v3646_v31, %v3677_v2 }
 0x3b5   :  { %v1159_v7 = vpop.xlane.xlu1 %1158  ;;  %v469_v34 = vpop.xlane.xlu0 %468 }
 0x3b6   :  { %v1054_v51 = vadd.f32 %v1040_v8, %v938_v22  ;;  %v593_v44 = vadd.f32 %v3204_v20, %v469_v34  ;;  %v1279_v20 = vsel %vm200_vm9, %v3323_v62, 0.0  ;;  %v627_v40 = vsel %vm200_vm9, %v605_v55, 0.0 }
 0x3b8   :  { %1277 = vadd.xlane.f32.xlu0 %v1276_v43  ;;  %512 = vadd.xlane.f32.xlu1 %v511_v13  ;;  %v1170_v12 = vadd.f32 %v1156_v49, %v1054_v51  ;;  %v3678_v49 = vld [vmem:[#allocation19_spill] sm:$0xff]  ;;  %v3679_v43 = vld [vmem:[#allocation4_spill] sm:$0xff]  ;;  %v1295_v13 = vmul.f32 %v3673_v19, %v3680_v4 }
 0x3b9   :  { %v3327_v11 = vpop.xlane.xlu1 %1440  ;;  %v811_v8 = vpop.xlane.xlu0 %810  ;;  %v1392_v51 = vsel %vm200_vm9, %v3678_v49, 0.0 }
 0x3ba   :  { %v823_v56 = vadd.f32 %v811_v8, %v707_v27  ;;  %v853_v27 = vsel %vm200_vm9, %v3679_v43, 0.0 }
 0x3bc   :  { %v939_v39 = vadd.f32 %v3243_v5, %v823_v56  ;;  %1280 = vadd.xlane.f32.xlu0 %v1279_v20  ;;  %628 = vadd.xlane.f32.xlu1 %v627_v40 }
 0x3bd   :  { %v1272_v21 = vpop.xlane.xlu1 %1271  ;;  %v698_v22 = vpop.xlane.xlu0 %697 }
 0x3be   :  { %v1055_v0 = vadd.f32 %v1043_v30, %v939_v39  ;;  %v3333_v31 = vadd.f32 %v1272_v21, %v1170_v12  ;;  %v708_v34 = vadd.f32 %v698_v22, %v592_v57  ;;  %v1508_v57 = vsel %vm200_vm9, %v3064_v48, 0.0  ;;  %v3681_v39 = vld [vmem:[#allocation33_spill] sm:$0xff] }
 0x3bf   :  { %v1305_v12 = vsel %vm200_vm9, %v1295_v13, 0.0  ;;  %v950_v21 = vmul.f32 %v2347_v41, %v3681_v39  ;;  %v969_v13 = vsel %vm200_vm9, %v3006_v17, 0.0  ;;  %v1614_v17 = vld [vmem:[%s3520_s0 + $0x38] sm:$0xff] }
 0x3c0   :  { %1393 = vadd.xlane.f32.xlu0 %v1392_v51  ;;  %854 = vadd.xlane.f32.xlu1 %v853_v27  ;;  %v1171_v5 = vadd.f32 %v1159_v7, %v1055_v0  ;;  %v740_v7 = vsel %vm200_vm9, %v2995_v1, 0.0 }
 0x3c1   :  { %v3341_v2 = vpop.xlane.xlu1 %1553  ;;  %v1150_v55 = vpop.xlane.xlu0 %1149  ;;  %v966_v0 = vsel %vm200_vm9, %v950_v21, 0.0  ;;  %1914 = vmatprep.subr.mxu1 %v1614_v17 }
 0x3c2   :  { %v1168_v30 = vadd.f32 %v1150_v55, %v3246_v47  ;;  %1915 = vmatpush3.msra.mxu1 %v1614_v17 }
 0x3c4   :  { %1509 = vadd.xlane.f32.xlu0 %v1508_v57  ;;  %1306 = vadd.xlane.f32.xlu1 %v1305_v12  ;;  %v856_v57 = vsel %vm200_vm9, %v3010_v14, 0.0 }
 0x3c5   :  { %v1275_v8 = vpop.xlane.xlu1 %1274  ;;  %v701_v56 = vpop.xlane.xlu0 %700 }
 0x3c6   :  { %v3347_v20 = vadd.f32 %v1275_v8, %v1171_v5  ;;  %v709_v40 = vadd.f32 %v701_v56, %v593_v44  ;;  %v743_v44 = vsel %vm200_vm9, %v3003_v60, 0.0  ;;  %v1613_v56 = vld [vmem:[%s3520_s0 + $0x30] sm:$0xff] }
 0x3c7   :  { %1916 = vmatprep.subr.mxu1 %v1613_v56 }
 0x3c8   :  { %741 = vadd.xlane.f32.xlu1 %v740_v7  ;;  %v1612_v7 = vld [vmem:[%s3520_s0 + $0x28] sm:$0xff]  ;;  %1917 = vmatpush3.msra.mxu1 %v1613_v56  ;;  %v1207_v56 = vsel %vm200_vm9, %v3034_v10, 0.0 }
 0x3c9   :  { %v3353_v47 = vpop.xlane.xlu1 %1556  ;;  %v1153_v22 = vpop.xlane.xlu0 %1152  ;;  %1918 = vmatprep.subr.mxu1 %v1612_v7 }
 0x3ca   :  { %v1169_v48 = vadd.f32 %v1153_v22, %v3273_v54  ;;  %v1611_v22 = vld [vmem:[%s3520_s0 + $0x20] sm:$0xff]  ;;  %1919 = vmatpush3.msra.mxu1 %v1612_v7 }
 0x3cb   :  { %1920 = vmatprep.subr.mxu1 %v1611_v22 }
 0x3cc   :  { %967 = vadd.xlane.f32.xlu1 %v966_v0  ;;  %1921 = vmatpush3.msra.mxu1 %v1611_v22 }
 0x3cd   :  { %v814_v49 = vpop.xlane.xlu0 %813  ;;  %v492_v51 = vpop.xlane.xlu1 %491 }
 0x3ce   :  { %v824_v43 = vadd.f32 %v814_v49, %v708_v34  ;;  %v1610_v49 = vld [vmem:[%s3520_s0 + $0x18] sm:$0xff] }
 0x3cf   :  { %1922 = vmatprep.subr.mxu1 %v1610_v49 }
 0x3d0   :  { %744 = vadd.xlane.f32.xlu1 %v743_v44  ;;  %v1609_v44 = vld [vmem:[%s3520_s0 + $0x10] sm:$0xff]  ;;  %1923 = vmatpush3.msra.mxu1 %v1610_v49 }
 0x3d1   :  { %v1266_v1 = vpop.xlane.xlu0 %1265  ;;  %v608_v27 = vpop.xlane.xlu1 %607  ;;  %1924 = vmatprep.subr.mxu1 %v1609_v44 }
 0x3d2   :  { %v3359_v4 = vadd.f32 %v1266_v1, %v1168_v30  ;;  %v630_v41 = vadd.f32 %v608_v27, %v492_v51  ;;  %v1082_v30 = vsel %vm200_vm9, %v3015_v45, 0.0  ;;  %v859_v45 = vsel %vm200_vm9, %v3019_v36, 0.0  ;;  %1925 = vmatpush3.msra.mxu1 %v1609_v44 }
 0x3d3   :  { %v1085_v36 = vsel %vm200_vm9, %v3026_v16, 0.0  ;;  %v1607_v16 = vld [vmem:[%s3520_s0] sm:$0xff] }
 0x3d4   :  { %970 = vadd.xlane.f32.xlu1 %v969_v13 }
 0x3d5   :  { %v817_v54 = vpop.xlane.xlu0 %816  ;;  %v495_v5 = vpop.xlane.xlu1 %494 }
 0x3d6   :  { %v825_v55 = vadd.f32 %v817_v54, %v709_v40  ;;  %v1502_v54 = vsel %vm200_vm9, %v2969_v18, 0.0 }
 0x3d8   :  { %857 = vadd.xlane.f32.xlu1 %v856_v57 }
 0x3d9   :  { %v1269_v34 = vpop.xlane.xlu0 %1268  ;;  %v611_v12 = vpop.xlane.xlu1 %610 }
 0x3da   :  { %v3365_v60 = vadd.f32 %v1269_v34, %v1169_v48  ;;  %v631_v8 = vadd.f32 %v611_v12, %v495_v5  ;;  %v1204_v12 = vsel %vm200_vm9, %v3030_v63, 0.0 }
 0x3dc   :  { %1083 = vadd.xlane.f32.xlu1 %v1082_v30 }
 0x3dd   :  { %v930_v14 = vpop.xlane.xlu0 %929  ;;  %v724_v40 = vpop.xlane.xlu1 %723 }
 0x3de   :  { %v940_v39 = vadd.f32 %v930_v14, %v824_v43  ;;  %v746_v21 = vadd.f32 %v724_v40, %v630_v41  ;;  %v1608_v41 = vld [vmem:[%s3520_s0 + $0x8] sm:$0xff]  ;;  %v1300_v14 = vmul.f32 %v3673_v19, %v3313_v32 }
 0x3df   :  { %1926 = vmatprep.subr.mxu1 %v1608_v41 }
 0x3e0   :  { %860 = vadd.xlane.f32.xlu1 %v859_v45  ;;  %1927 = vmatpush3.msra.mxu1 %v1608_v41  ;;  %v1320_v63 = vsel %vm200_vm9, %v1300_v14, 0.0  ;;  %v1301_v45 = vmul.f32 %v3673_v19, %v3323_v62 }
 0x3e1   :  { %v933_v48 = vpop.xlane.xlu0 %932  ;;  %v727_v0 = vpop.xlane.xlu1 %726  ;;  %1928 = vmatprep.subr.mxu1 %v1607_v16 }
 0x3e2   :  { %v941_v51 = vadd.f32 %v933_v48, %v825_v55  ;;  %v747_v43 = vadd.f32 %v727_v0, %v631_v8  ;;  %1929 = vmatpush3.msra.mxu1 %v1607_v16  ;;  %v1323_v0 = vsel %vm200_vm9, %v1301_v45, 0.0 }
 0x3e4   :  { %1086 = vadd.xlane.f32.xlu1 %v1085_v36 }
 0x3e5   :  { %v1046_v1 = vpop.xlane.xlu0 %1045  ;;  %v498_v27 = vpop.xlane.xlu1 %497 }
 0x3e6   :  { %v1056_v13 = vadd.f32 %v1046_v1, %v940_v39  ;;  %v3682_v1 = vld [vmem:[#allocation21_spill] sm:$0xff] }
 0x3e8   :  { %1503 = vadd.xlane.f32.xlu1 %v1502_v54 }
 0x3e9   :  { %v1049_v5 = vpop.xlane.xlu0 %1048  ;;  %v614_v55 = vpop.xlane.xlu1 %613 }
 0x3ea   :  { %v1057_v57 = vadd.f32 %v1049_v5, %v941_v51  ;;  %v632_v34 = vadd.f32 %v614_v55, %v498_v27  ;;  %v1505_v51 = vsel %vm200_vm9, %v3023_v24, 0.0  ;;  %v1395_v27 = vsel %vm200_vm9, %v3682_v1, 0.0 }
 0x3ec   :  { %1205 = vadd.xlane.f32.xlu1 %v1204_v12 }
 0x3ed   :  { %v1162_v8 = vpop.xlane.xlu0 %1161  ;;  %v840_v18 = vpop.xlane.xlu1 %839 }
 0x3ee   :  { %v3401_v30 = vadd.f32 %v1162_v8, %v1056_v13  ;;  %v3403_v17 = vadd.f32 %v840_v18, %v746_v21  ;;  %v1511_v13 = vsel %vm200_vm9, %v3087_v59, 0.0 }
 0x3f0   :  { %1208 = vadd.xlane.f32.xlu1 %v1207_v56 }
 0x3f1   :  { %v1165_v40 = vpop.xlane.xlu0 %1164  ;;  %v617_v7 = vpop.xlane.xlu1 %616 }
 0x3f2   :  { %v3409_v39 = vadd.f32 %v1165_v40, %v1057_v57 }
 0x3f4   :  { %1321 = vadd.xlane.f32.xlu1 %v1320_v63 }
 0x3f5   :  { %v501_v22 = vpop.xlane.xlu0 %500  ;;  %v843_v21 = vpop.xlane.xlu1 %842 }
 0x3f6   :  { %v863_v48 = vadd.f32 %v843_v21, %v747_v43  ;;  %v633_v19 = vadd.f32 %v617_v7, %v501_v22 }
 0x3f8   :  { %1324 = vadd.xlane.f32.xlu1 %v1323_v0 }
 0x3f9   :  { %v846_v10 = vpop.xlane.xlu0 %845  ;;  %v730_v49 = vpop.xlane.xlu1 %729 }
 0x3fa   :  { %v748_v32 = vadd.f32 %v730_v49, %v632_v34 }
 0x3fc   :  { %1506 = vadd.xlane.f32.xlu1 %v1505_v51  ;;  %v864_v56 = vadd.f32 %v846_v10, %v748_v32 }
 0x3fd   :  { %v849_v36 = vpop.xlane.xlu0 %848  ;;  %v956_v44 = vpop.xlane.xlu1 %955 }
 0x400   :  { %1396 = vadd.xlane.f32.xlu1 %v1395_v27  ;;  %v3683_v27 = vld [vmem:[#allocation2_spill] sm:$0xff] }
 0x401   :  { %v962_v62 = vpop.xlane.xlu0 %961  ;;  %v733_v41 = vpop.xlane.xlu1 %732 }
 0x402   :  { %v749_v43 = vadd.f32 %v733_v41, %v633_v19  ;;  %v980_v14 = vadd.f32 %v962_v62, %v864_v56  ;;  %v3426_v19 = vcvt.s32.f32 %v3683_v27 }
 0x404   :  { %1512 = vadd.xlane.f32.xlu1 %v1511_v13  ;;  %v865_v40 = vadd.f32 %v849_v36, %v749_v43 }
 0x405   :  { %v965_v54 = vpop.xlane.xlu0 %964  ;;  %v959_v16 = vpop.xlane.xlu1 %958 }
 0x406   :  { %v3421_v5 = vadd.f32 %v959_v16, %v863_v48  ;;  %v981_v59 = vadd.f32 %v965_v54, %v865_v40  ;;  %v1400_v16 = vadd.f32 %v3106_v26, %v3359_v4 }
 0x409   :  { %v1078_v24 = vpop.xlane.xlu0 %1077  ;;  %v504_v55 = vpop.xlane.xlu1 %503 }
 0x40a   :  { %v1096_v45 = vadd.f32 %v1078_v24, %v980_v14 }
 0x40d   :  { %v1081_v57 = vpop.xlane.xlu0 %1080  ;;  %v620_v34 = vpop.xlane.xlu1 %619 }
 0x40e   :  { %v3423_v12 = vadd.f32 %v620_v34, %v504_v55  ;;  %v1097_v48 = vadd.f32 %v1081_v57, %v981_v59 }
 0x411   :  { %v1194_v8 = vpop.xlane.xlu0 %1193  ;;  %v1072_v18 = vpop.xlane.xlu1 %1071 }
 0x412   :  { %v1212_v22 = vadd.f32 %v1194_v8, %v1096_v45  ;;  %v1516_v8 = vadd.f32 %v3122_v61, %v1400_v16 }
 0x415   :  { %v1197_v7 = vpop.xlane.xlu0 %1196  ;;  %v507_v63 = vpop.xlane.xlu1 %506 }
 0x416   :  { %v1213_v1 = vadd.f32 %v1197_v7, %v1097_v48 }
 0x419   :  { %v1310_v21 = vpop.xlane.xlu0 %1309  ;;  %v623_v0 = vpop.xlane.xlu1 %622 }
 0x41a   :  { %v1328_v49 = vadd.f32 %v1310_v21, %v1212_v22  ;;  %v635_v51 = vadd.f32 %v623_v0, %v507_v63  ;;  %v978_v21 = vadd.f32 %v956_v44, %v3403_v17 }
 0x41c   :  { %v1444_v41 = vadd.f32 %v3154_v46, %v1328_v49  ;;  %v1094_v61 = vadd.f32 %v1072_v18, %v978_v21 }
 0x41d   :  { %v1313_v13 = vpop.xlane.xlu0 %1312  ;;  %v1075_v10 = vpop.xlane.xlu1 %1074 }
 0x41e   :  { %v1560_v32 = vadd.f32 %v3199_v37, %v1444_v41  ;;  %v1329_v36 = vadd.f32 %v1313_v13, %v1213_v1  ;;  %v1401_v37 = vadd.f32 %v3114_v15, %v3365_v60  ;;  %v1398_v13 = vadd.f32 %v3068_v6, %v3258_v50 }
 0x41f   :  { %v1095_v18 = vadd.f32 %v1075_v10, %v3421_v5 }
 0x420   :  { %v1569_v62 = vsub.f32 %v3426_v19, %v1560_v32  ;;  %v1445_v43 = vadd.f32 %v3172_v38, %v1329_v36  ;;  %v1517_v63 = vadd.f32 %v3130_v33, %v1401_v37  ;;  %v1514_v36 = vadd.f32 %v3089_v42, %v1398_v13  ;;  %v3684_v42 = vld [vmem:[#allocation20_spill] sm:$0xff] }
 0x421   :  { %v3432_v54 = vpop.xlane.xlu1 %735  ;;  %v3446_v41 = vpop.xlane.xlu0 %973  ;;  %v1399_v10 = vadd.f32 %v3684_v42, %v3281_v35 }
 0x422   :  { %v1577_v24 = vand.u32 2147483647, %v1569_v62  ;;  %v1561_v55 = vadd.f32 %v3223_v25, %v1445_v43 }
 0x424   :  { %v1585_v57 = vsub.f32 1.0, %v1577_v24  ;;  %v1570_v46 = vsub.f32 %v3426_v19, %v1561_v55 }
 0x425   :  { %v1188_v34 = vpop.xlane.xlu1 %1187 }
 0x426   :  { %v1593_v56 = vmax.f32 %v1585_v57, 0.0  ;;  %v1578_v14 = vand.u32 2147483647, %v1570_v46  ;;  %v1210_v48 = vadd.f32 %v1188_v34, %v1094_v61 }
 0x428   :  { %v1586_v38 = vsub.f32 1.0, %v1578_v14  ;;  %v1601_v40 = vmul.f32 %v1593_v56, %v1516_v8  ;;  %v3685_v14 = vld [vmem:[#allocation25_spill] sm:$0xff] }
 0x429   :  { %v739_v7 = vpop.xlane.xlu1 %738 }
 0x42a   :  { %v1594_v26 = vmax.f32 %v1586_v38, 0.0  ;;  %v751_v4 = vadd.f32 %v739_v7, %v635_v51  ;;  %v1515_v38 = vadd.f32 %v3685_v14, %v1399_v10 }
 0x42c   :  { %v1602_v45 = vmul.f32 %v1594_v26, %v1517_v63 }
 0x42d   :  { %v1191_v25 = vpop.xlane.xlu1 %1190 }
 0x42e   :  { %v1211_v43 = vadd.f32 %v1191_v25, %v1095_v18 }
 0x431   :  { %v510_v59 = vpop.xlane.xlu1 %509 }
 0x435   :  { %v626_v22 = vpop.xlane.xlu1 %625 }
 0x439   :  { %v852_v0 = vpop.xlane.xlu1 %851 }
 0x43d   :  { %v1304_v49 = vpop.xlane.xlu1 %1303 }
 0x43e   :  { %v1326_v15 = vadd.f32 %v1304_v49, %v1210_v48 }
 0x440   :  { %v1442_v60 = vadd.f32 %v3097_v23, %v1326_v15  ;;  %v1200_v23 = vpop.xlane.xlu0 %1199 }
 0x441   :  { %v513_v1 = vpop.xlane.xlu1 %512 }
 0x442   :  { %v1558_v27 = vadd.f32 %v3120_v29, %v1442_v60 }
 0x444   :  { %v1567_v33 = vsub.f32 %v3426_v19, %v1558_v27  ;;  %v977_v57 = vpop.xlane.xlu0 %976 }
 0x445   :  { %v629_v51 = vpop.xlane.xlu1 %628 }
 0x446   :  { %v1575_v32 = vand.u32 2147483647, %v1567_v33 }
 0x448   :  { %v1583_v17 = vsub.f32 1.0, %v1575_v32  ;;  %v1203_v8 = vpop.xlane.xlu0 %1202 }
 0x449   :  { %v855_v44 = vpop.xlane.xlu1 %854 }
 0x44a   :  { %v1591_v62 = vmax.f32 %v1583_v17, 0.0  ;;  %v867_v33 = vadd.f32 %v855_v44, %v751_v4  ;;  %v3686_v17 = vld [vmem:[#allocation27_spill] sm:$0xff] }
 0x44c   :  { %v1599_v29 = vmul.f32 %v1591_v62, %v1514_v36  ;;  %v1090_v26 = vpop.xlane.xlu0 %1089 }
 0x44d   :  { %v1307_v16 = vpop.xlane.xlu1 %1306 }
 0x44e   :  { %v1327_v24 = vadd.f32 %v1307_v16, %v1211_v43  ;;  %1930 = vmatprep.mubr.msk.f32.mxu1 %vm1615_vm5, %v1599_v29 }
 0x450   :  { %v1443_v55 = vadd.f32 %v3104_v9, %v1327_v24  ;;  %v1316_v35 = vpop.xlane.xlu0 %1315 }
 0x451   :  { %v742_v6 = vpop.xlane.xlu1 %741 }
 0x452   :  { %v1559_v50 = vadd.f32 %v3136_v52, %v1443_v55  ;;  %v750_v52 = vadd.f32 %v3432_v54, %v3423_v12 }
 0x454   :  { %v1568_v46 = vsub.f32 %v3426_v19, %v1559_v50  ;;  %v866_v21 = vadd.f32 %v852_v0, %v750_v52  ;;  %v1093_v60 = vpop.xlane.xlu0 %1092  ;;  %v3687_v50 = vld [vmem:[#allocation24_spill] sm:$0xff] }
 0x455   :  { %v968_v5 = vpop.xlane.xlu1 %967 }
 0x456   :  { %v1576_v34 = vand.u32 2147483647, %v1568_v46  ;;  %v982_v61 = vadd.f32 %v968_v5, %v866_v21 }
 0x458   :  { %v1584_v37 = vsub.f32 1.0, %v1576_v34  ;;  %v1319_v54 = vpop.xlane.xlu0 %1318 }
 0x459   :  { %v745_v56 = vpop.xlane.xlu1 %744 }
 0x45a   :  { %v1592_v7 = vmax.f32 %v1584_v37, 0.0 }
 0x45c   :  { %v1600_v63 = vmul.f32 %v1592_v7, %v1515_v38  ;;  %v1278_v46 = vpop.xlane.xlu0 %1277 }
 0x45d   :  { %v971_v9 = vpop.xlane.xlu1 %970 }
 0x45e   :  { %1931 = vmatmul.mubr.msk.f32.vlgmr.msra.gmra.mxu1 %vm1615_vm5, %v1600_v63  ;;  %v983_v32 = vadd.f32 %v971_v9, %v867_v33 }
 0x45f   :  { %1933 = vmatprep.mubr.msk.f32.mxu1 %vm1615_vm5, %v1601_v40  ;;  %v636_v40 = vadd.f32 %v626_v22, %v510_v59  ;;  %v1402_v59 = vadd.f32 %v3687_v50, %v3333_v31 }
 0x461   :  { %v858_v25 = vpop.xlane.xlu1 %857  ;;  %v752_v0 = vadd.f32 %v742_v6, %v636_v40 }
 0x462   :  { %1934 = vmatmul.mubr.msk.f32.gmra.mxu1 %vm1615_vm5, %v1602_v45 }
 0x463   :  { %v868_v29 = vadd.f32 %v858_v25, %v752_v0 }
 0x465   :  { %v1084_v48 = vpop.xlane.xlu1 %1083 }
 0x466   :  { %v1098_v49 = vadd.f32 %v1084_v48, %v982_v61  ;;  %v3688_v61 = vld [vmem:[#allocation26_spill] sm:$0xff] }
 0x467   :  { %v1403_v48 = vadd.f32 %v3688_v61, %v3347_v20 }
 0x468   :  { %v1214_v15 = vadd.f32 %v1200_v23, %v1098_v49  ;;  %v637_v23 = vadd.f32 %v629_v51, %v513_v1  ;;  %v1288_v49 = vadd.f32 %v1278_v46, %v3401_v30 }
 0x469   :  { %v861_v27 = vpop.xlane.xlu1 %860 }
 0x46a   :  { %v1330_v13 = vadd.f32 %v1316_v35, %v1214_v15  ;;  %v753_v4 = vadd.f32 %v745_v56, %v637_v23  ;;  %v1281_v56 = vpop.xlane.xlu0 %1280 }
 0x46c   :  { %v1446_v18 = vadd.f32 %v3686_v17, %v1330_v13  ;;  %v869_v6 = vadd.f32 %v861_v27, %v753_v4 }
 0x46d   :  { %v1087_v36 = vpop.xlane.xlu1 %1086 }
 0x46e   :  { %v1099_v62 = vadd.f32 %v1087_v36, %v983_v32  ;;  %v1562_v12 = vadd.f32 %v3270_v3, %v1446_v18  ;;  %v984_v3 = vadd.f32 %v3446_v41, %v868_v29  ;;  %v985_v51 = vadd.f32 %v977_v57, %v869_v6  ;;  %v1394_v52 = vpop.xlane.xlu0 %1393 }
 0x46f   :  { %v1404_v32 = vadd.f32 %v1394_v52, %v1288_v49 }
 0x470   :  { %v1215_v45 = vadd.f32 %v1203_v8, %v1099_v62  ;;  %v1571_v43 = vsub.f32 %v3426_v19, %v1562_v12  ;;  %v1100_v37 = vadd.f32 %v1090_v26, %v984_v3  ;;  %v1101_v38 = vadd.f32 %v1093_v60, %v985_v51 }
 0x471   :  { %v1504_v16 = vpop.xlane.xlu1 %1503 }
 0x472   :  { %v1331_v24 = vadd.f32 %v1319_v54, %v1215_v45  ;;  %v1579_v55 = vand.u32 2147483647, %v1571_v43  ;;  %v1518_v10 = vadd.f32 %v1504_v16, %v1402_v59  ;;  %v1510_v13 = vpop.xlane.xlu0 %1509 }
 0x473   :  { %v1520_v36 = vadd.f32 %v1510_v13, %v1404_v32 }
 0x474   :  { %v1447_v44 = vadd.f32 %v3255_v58, %v1331_v24  ;;  %v1587_v22 = vsub.f32 1.0, %v1579_v55 }
 0x475   :  { %v1206_v5 = vpop.xlane.xlu1 %1205 }
 0x476   :  { %v1595_v42 = vmax.f32 %v1587_v22, 0.0  ;;  %v1563_v34 = vadd.f32 %v3290_v53, %v1447_v44  ;;  %v1216_v31 = vadd.f32 %v1206_v5, %v1100_v37 }
 0x478   :  { %v1603_v8 = vmul.f32 %v1595_v42, %v1518_v10  ;;  %v1572_v58 = vsub.f32 %v3426_v19, %v1563_v34 }
 0x479   :  { %v1209_v1 = vpop.xlane.xlu1 %1208 }
 0x47a   :  { %1936 = vmatprep.mubr.msk.f32.mxu1 %vm1615_vm5, %v1603_v8  ;;  %v1580_v41 = vand.u32 2147483647, %v1572_v58  ;;  %v1217_v63 = vadd.f32 %v1209_v1, %v1101_v38 }
 0x47c   :  { %v1588_v57 = vsub.f32 1.0, %v1580_v41 }
 0x47d   :  { %v1322_v14 = vpop.xlane.xlu1 %1321 }
 0x47e   :  { %v1332_v7 = vadd.f32 %v1322_v14, %v1216_v31 }
 0x480   :  { %v1448_v9 = vadd.f32 %v3305_v28, %v1332_v7  ;;  %v1596_v28 = vmax.f32 %v1588_v57, 0.0 }
 0x481   :  { %v1325_v25 = vpop.xlane.xlu1 %1324 }
 0x482   :  { %v1564_v53 = vadd.f32 %v3341_v2, %v1448_v9  ;;  %v1333_v21 = vadd.f32 %v1325_v25, %v1217_v63 }
 0x484   :  { %v1573_v26 = vsub.f32 %v3426_v19, %v1564_v53  ;;  %v1449_v35 = vadd.f32 %v3327_v11, %v1333_v21  ;;  %v1289_v11 = vadd.f32 %v1281_v56, %v3409_v39 }
 0x485   :  { %v1507_v15 = vpop.xlane.xlu1 %1506 }
 0x486   :  { %v1581_v60 = vand.u32 2147483647, %v1573_v26  ;;  %v1565_v27 = vadd.f32 %v3353_v47, %v1449_v35  ;;  %v1519_v33 = vadd.f32 %v1507_v15, %v1403_v48 }
 0x488   :  { %v1589_v2 = vsub.f32 1.0, %v1581_v60  ;;  %v1604_v17 = vmul.f32 %v1596_v28, %v1519_v33  ;;  %v1574_v18 = vsub.f32 %v3426_v19, %v1565_v27 }
 0x489   :  { %v1397_v40 = vpop.xlane.xlu1 %1396 }
 0x48a   :  { %v1597_v62 = vmax.f32 %v1589_v2, 0.0  ;;  %1937 = vmatmul.mubr.msk.f32.gmra.mxu1 %vm1615_vm5, %v1604_v17  ;;  %v1582_v20 = vand.u32 2147483647, %v1574_v18  ;;  %v1405_v30 = vadd.f32 %v1397_v40, %v1289_v11 }
 0x48c   :  { %v1590_v12 = vsub.f32 1.0, %v1582_v20  ;;  %v1605_v54 = vmul.f32 %v1597_v62, %v1520_v36 }
 0x48d   :  { %v1513_v47 = vpop.xlane.xlu1 %1512 }
 0x48e   :  { %v1598_v0 = vmax.f32 %v1590_v12, 0.0  ;;  %v1521_v45 = vadd.f32 %v1513_v47, %v1405_v30  ;;  %1939 = vmatprep.mubr.msk.f32.mxu1 %vm1615_vm5, %v1605_v54 }
 0x490   :  { %v1606_v43 = vmul.f32 %v1598_v0, %v1521_v45 }
 0x492   :  { %1940 = vmatmul.mubr.msk.f32.gmra.mxu1 %vm1615_vm5, %v1606_v43 }
 0x51e   :  { %v1932_v19 = vpop.f32.mrf.mxu1 }
 0x51f   :  { %1746 = vst.msk [vmem:[%s3521_s2 + $0x8] sm:$0xff] %vm200_vm9, %v1932_v19 }
 0x520   :  { %v1706_v39 = vpop.f32.mrf.mxu1 }
 0x521   :  { %1745 = vst.msk [vmem:[%s3521_s2] sm:$0xff] %vm200_vm9, %v1706_v39 }
 0x522   :  { %v1935_v29 = vpop.f32.mrf.mxu1 }
 0x523   :  { %1748 = vst.msk [vmem:[%s3521_s2 + $0x18] sm:$0xff] %vm200_vm9, %v1935_v29 }
 0x524   :  { %v1716_v16 = vpop.f32.mrf.mxu1 }
 0x525   :  { %1747 = vst.msk [vmem:[%s3521_s2 + $0x10] sm:$0xff] %vm200_vm9, %v1716_v16 }
 0x54a   :  { %v1938_v23 = vpop.f32.mrf.mxu1 }
 0x54b   :  { %1750 = vst.msk [vmem:[%s3521_s2 + $0x28] sm:$0xff] %vm200_vm9, %v1938_v23 }
 0x54c   :  { %v1726_v24 = vpop.f32.mrf.mxu1 }
 0x54d   :  { %1749 = vst.msk [vmem:[%s3521_s2 + $0x20] sm:$0xff] %vm200_vm9, %v1726_v24 }
 0x552   :  { %v1941_v55 = vpop.f32.mrf.mxu1 }
 0x553   :  { %1752 = vst.msk [vmem:[%s3521_s2 + $0x38] sm:$0xff] %vm200_vm9, %v1941_v55 }
 0x554   :  { %v1736_v4 = vpop.f32.mrf.mxu1 }
 0x555   :  { %1751 = vst.msk [vmem:[%s3521_s2 + $0x30] sm:$0xff] %vm200_vm9, %v1736_v4 }

</bundles_post_ra>
